<compile_context>
chip_gen: v5e
topology: v5e:2x2
jax: 0.10.0
libtpu: 0.0.40
codegen_flags: <defaults>
</compile_context>

<pallas_src>
import functools

import jax
import jax.numpy as jnp
from jax.experimental import pallas as pl
from jax.experimental.pallas import tpu as pltpu

EPS = 1e-5          # nn.BatchNorm2d default
NEG_SLOPE = 0.01    # nn.LeakyReLU default
LANE = 128          # TPU lane width


# ---------------------------------------------------------------------------
# small helpers
# ---------------------------------------------------------------------------
def _round_up(x, m):
    return (x + m - 1) // m * m


def _pad2d(a, rows, cols):
    r, c = a.shape
    return jnp.pad(a, ((0, rows - r), (0, cols - c)))


def _cparams():
    # Pixel-row axis is embarrassingly parallel (per-tile partial stats, no
    # carried accumulator) -> "parallel" lets v7x's two TensorCores split it.
    # Explicit VMEM budget keeps double-buffering alive on v5e (16 MiB default
    # scoped VMEM) while staying well inside v7x's 64 MiB physical VMEM.
    return pltpu.CompilerParams(
        dimension_semantics=("parallel",),
        vmem_limit_bytes=32 * 1024 * 1024,
    )


# ---------------------------------------------------------------------------
# Pallas kernels
# ---------------------------------------------------------------------------
def _matmul_stats_kernel(a_ref, b_ref, y_ref, stats_ref):
    # conv-as-matmul (bf16 MXU, f32 accumulate) fused with per-tile BN stats.
    # Output y is stored in bf16 (halves HBM writeback + downstream reads);
    # stats are taken from the f32 accumulator.  Stats rows are written
    # directly (no concat / zero-block materialization); rows 2..7 of the
    # (8, Cp) stats block are never read.
    y = jnp.dot(a_ref[...], b_ref[...], preferred_element_type=jnp.float32)
    y_ref[...] = y.astype(y_ref.dtype)
    stats_ref[0:1, :] = jnp.sum(y, axis=0, keepdims=True)
    stats_ref[1:2, :] = jnp.sum(y * y, axis=0, keepdims=True)


def _apply_in_affine_act(a_ref, sc_ref, sh_ref):
    # bn1 affine + LeakyReLU applied to the (raw y1) patch operand in f32,
    # then cast back to bf16 for the MXU.  Lands on the VPU slot, which has
    # slack because the pass is HBM/DMA-bound.
    a = a_ref[...].astype(jnp.float32) * sc_ref[...] + sh_ref[...]
    a = jnp.where(a >= 0, a, NEG_SLOPE * a)
    return a.astype(jnp.bfloat16)


def _valid_row_mask(tm, m_true):
    # Zero-padded rows of the patch matrix stop being zero after the fused
    # affine (0*scale + shift != 0), so the stats of the fused kernels must
    # mask out rows >= M (the true pixel count).
    rows = jax.lax.broadcasted_iota(jnp.int32, (tm, 1), 0) + pl.program_id(0) * tm
    return rows < m_true


def _affmm_stats_kernel(a_ref, sc_ref, sh_ref, b_ref, y_ref, stats_ref, *, m_true):
    # conv2 with the bn1 affine + LeakyReLU fused into the operand path.
    a = _apply_in_affine_act(a_ref, sc_ref, sh_ref)
    y = jnp.dot(a, b_ref[...], preferred_element_type=jnp.float32)
    y_ref[...] = y.astype(y_ref.dtype)
    ym = jnp.where(_valid_row_mask(y.shape[0], m_true), y, 0.0)
    stats_ref[0:1, :] = jnp.sum(ym, axis=0, keepdims=True)
    stats_ref[1:2, :] = jnp.sum(ym * ym, axis=0, keepdims=True)


def _dual_affmm_stats_kernel(a2_ref, sc_ref, sh_ref, b2_ref, aid_ref, bid_ref,
                             y2_ref, yid_ref, st2_ref, stid_ref, *, m_true):
    # Merged conv2 (with fused bn1 affine+act operand) + 1x1 shortcut conv:
    # two MXU pushes per pixel tile under one DMA shadow, one pallas_call.
    a2 = _apply_in_affine_act(a2_ref, sc_ref, sh_ref)
    y2 = jnp.dot(a2, b2_ref[...], preferred_element_type=jnp.float32)
    y2_ref[...] = y2.astype(y2_ref.dtype)
    y2m = jnp.where(_valid_row_mask(y2.shape[0], m_true), y2, 0.0)
    st2_ref[0:1, :] = jnp.sum(y2m, axis=0, keepdims=True)
    st2_ref[1:2, :] = jnp.sum(y2m * y2m, axis=0, keepdims=True)

    yid = jnp.dot(aid_ref[...], bid_ref[...], preferred_element_type=jnp.float32)
    yid_ref[...] = yid.astype(yid_ref.dtype)
    # Shortcut patches are zero-row-padded (no prologue), so no mask needed.
    stid_ref[0:1, :] = jnp.sum(yid, axis=0, keepdims=True)
    stid_ref[1:2, :] = jnp.sum(yid * yid, axis=0, keepdims=True)


def _affine_add_act_kernel(y_ref, sc_ref, sh_ref, r_ref, rsc_ref, rsh_ref, o_ref):
    # Fused epilogue: bn2(y2) + shortcut-BN(residual) (or raw identity with
    # scale=1, shift=0), then LeakyReLU.  bf16 operands upcast; math in f32
    # (v5e-safe).
    out = (y_ref[...].astype(jnp.float32) * sc_ref[...] + sh_ref[...]
           + r_ref[...].astype(jnp.float32) * rsc_ref[...] + rsh_ref[...])
    o_ref[...] = jnp.where(out >= 0, out, NEG_SLOPE * out)


# ---------------------------------------------------------------------------
# pallas_call wrappers (tiled over the pixel axis M)
# ---------------------------------------------------------------------------
def conv_bn_stats(a, b, tm):
    """Matmul + per-tile BN stats.  a: (Mp, Kp) bf16, b: (Kp, Cp) bf16."""
    mp, kp = a.shape
    cp = b.shape[1]
    nt = mp // tm
    return pl.pallas_call(
        _matmul_stats_kernel,
        out_shape=(jax.ShapeDtypeStruct((mp, cp), jnp.bfloat16),
                   jax.ShapeDtypeStruct((nt * 8, cp), jnp.float32)),
        grid=(nt,),
        in_specs=[pl.BlockSpec((tm, kp), lambda i: (i, 0)),
                  pl.BlockSpec((kp, cp), lambda i: (0, 0))],
        out_specs=[pl.BlockSpec((tm, cp), lambda i: (i, 0)),
                   pl.BlockSpec((8, cp), lambda i: (i, 0))],
        compiler_params=_cparams(),
    )(a, b)


def conv_bn_stats_fused_in(a, sc, sh, b, tm, m_true):
    """conv2 matmul + stats with bn1 affine + LeakyReLU fused on the operand."""
    mp, kp = a.shape
    cp = b.shape[1]
    nt = mp // tm
    return pl.pallas_call(
        functools.partial(_affmm_stats_kernel, m_true=m_true),
        out_shape=(jax.ShapeDtypeStruct((mp, cp), jnp.bfloat16),
                   jax.ShapeDtypeStruct((nt * 8, cp), jnp.float32)),
        grid=(nt,),
        in_specs=[pl.BlockSpec((tm, kp), lambda i: (i, 0)),
                  pl.BlockSpec((1, kp), lambda i: (0, 0)),
                  pl.BlockSpec((1, kp), lambda i: (0, 0)),
                  pl.BlockSpec((kp, cp), lambda i: (0, 0))],
        out_specs=[pl.BlockSpec((tm, cp), lambda i: (i, 0)),
                   pl.BlockSpec((8, cp), lambda i: (i, 0))],
        compiler_params=_cparams(),
    )(a, sc, sh, b)


def dual_conv_bn_stats(a2, sc, sh, b2, aid, bid, tm, m_true):
    """Merged conv2 (fused bn1 operand) + 1x1 shortcut conv, one pixel grid."""
    mp, kp2 = a2.shape
    kpid = aid.shape[1]
    cp = b2.shape[1]
    nt = mp // tm
    return pl.pallas_call(
        functools.partial(_dual_affmm_stats_kernel, m_true=m_true),
        out_shape=(jax.ShapeDtypeStruct((mp, cp), jnp.bfloat16),
                   jax.ShapeDtypeStruct((mp, cp), jnp.bfloat16),
                   jax.ShapeDtypeStruct((nt * 8, cp), jnp.float32),
                   jax.ShapeDtypeStruct((nt * 8, cp), jnp.float32)),
        grid=(nt,),
        in_specs=[pl.BlockSpec((tm, kp2), lambda i: (i, 0)),
                  pl.BlockSpec((1, kp2), lambda i: (0, 0)),
                  pl.BlockSpec((1, kp2), lambda i: (0, 0)),
                  pl.BlockSpec((kp2, cp), lambda i: (0, 0)),
                  pl.BlockSpec((tm, kpid), lambda i: (i, 0)),
                  pl.BlockSpec((kpid, cp), lambda i: (0, 0))],
        out_specs=[pl.BlockSpec((tm, cp), lambda i: (i, 0)),
                   pl.BlockSpec((tm, cp), lambda i: (i, 0)),
                   pl.BlockSpec((8, cp), lambda i: (i, 0)),
                   pl.BlockSpec((8, cp), lambda i: (i, 0))],
        compiler_params=_cparams(),
    )(a2, sc, sh, b2, aid, bid)


def affine_add_act(y, scale, shift, res, res_scale, res_shift, tm):
    mp, cp = y.shape
    nt = mp // tm
    return pl.pallas_call(
        _affine_add_act_kernel,
        out_shape=jax.ShapeDtypeStruct((mp, cp), jnp.float32),
        grid=(nt,),
        in_specs=[pl.BlockSpec((tm, cp), lambda i: (i, 0)),
                  pl.BlockSpec((1, cp), lambda i: (0, 0)),
                  pl.BlockSpec((1, cp), lambda i: (0, 0)),
                  pl.BlockSpec((tm, cp), lambda i: (i, 0)),
                  pl.BlockSpec((1, cp), lambda i: (0, 0)),
                  pl.BlockSpec((1, cp), lambda i: (0, 0))],
        out_specs=pl.BlockSpec((tm, cp), lambda i: (i, 0)),
        compiler_params=_cparams(),
    )(y, scale, shift, res, res_scale, res_shift)


# ---------------------------------------------------------------------------
# Plain-JAX glue: im2col (built in bf16), weight reshuffling, BN folding
# ---------------------------------------------------------------------------
def im2col(img, kh, kw, stride, padding, pad_value=None):
    """Patch extraction on an NHWC image (kept in its own dtype, i.e. bf16).

    pad_value (per-channel, len C) fills the spatial halo; None -> zeros.
    Column order is (tap_i, tap_j, channel), matching torch_weight_to_mat.
    """
    N, H, W, C = img.shape
    if padding > 0:
        hp, wp = H + 2 * padding, W + 2 * padding
        if pad_value is None:
            xp = jnp.pad(img, ((0, 0), (padding, padding), (padding, padding), (0, 0)))
        else:
            xp = jnp.broadcast_to(pad_value.reshape(1, 1, 1, C).astype(img.dtype),
                                  (N, hp, wp, C))
            xp = xp.at[:, padding:padding + H, padding:padding + W, :].set(img)
    else:
        xp = img
    Ho = (H + 2 * padding - kh) // stride + 1
    Wo = (W + 2 * padding - kw) // stride + 1
    cols = []
    for i in range(kh):
        for j in range(kw):
            cols.append(xp[:, i:i + stride * Ho:stride, j:j + stride * Wo:stride, :])
    patches = jnp.concatenate(cols, axis=-1)          # (N, Ho, Wo, kh*kw*C)
    return patches.reshape(N * Ho * Wo, kh * kw * C), (N, Ho, Wo)


def torch_weight_to_mat(w_oihw):
    # (Cout, Cin, kh, kw) -> (kh*kw*Cin, Cout), matching im2col's (i, j, c) order.
    Cout, Cin, kh, kw = w_oihw.shape
    return jnp.transpose(w_oihw, (2, 3, 1, 0)).reshape(kh * kw * Cin, Cout)


def finalize_stats(stats, m, cp):
    # Tiny cross-tile reduction + finalize (O(nt * cp) work) in plain JAX.
    nt = stats.shape[0] // 8
    st = stats.reshape(nt, 8, cp)
    s = jnp.sum(st[:, 0, :], axis=0)
    q = jnp.sum(st[:, 1, :], axis=0)
    mean = s / m
    var = jnp.maximum(q / m - mean * mean, 0.0)   # biased var, like torch train
    return mean, var


def bn_affine(mean, var, gamma, beta, cp):
    # Fold BN into scale/shift: out = y*scale + shift (channel-padded to cp).
    g = jnp.zeros((cp,), jnp.float32).at[:gamma.size].set(
        gamma.reshape(-1).astype(jnp.float32))
    b = jnp.zeros((cp,), jnp.float32).at[:beta.size].set(
        beta.reshape(-1).astype(jnp.float32))
    scale = g * jax.lax.rsqrt(var + EPS)
    shift = b - mean * scale
    return scale.reshape(1, cp), shift.reshape(1, cp)


# ---------------------------------------------------------------------------
# BasicBlock forward
# ---------------------------------------------------------------------------
def basic_block_forward(x_nchw, params, stride, padding, tm=512):
    N, Cin, H, W = x_nchw.shape
    Cout = params["conv1_w"].shape[0]
    Cp = _round_up(Cout, LANE)

    Ho = (H + 2 * padding - 3) // stride + 1
    Wo = (W + 2 * padding - 3) // stride + 1
    M = N * Ho * Wo
    tm = max(8, min(_round_up(tm, 8), _round_up(M, 8)))
    Mp = _round_up(M, tm)

    x_nhwc = jnp.transpose(x_nchw, (0, 2, 3, 1)).astype(jnp.float32)
    x_bf = x_nhwc.astype(jnp.bfloat16)   # bf16 from the start: bf16 patch tensors

    # ---- conv1: matmul + BN batch stats; y1 kept RAW (pre-affine) in bf16 ----
    p1, _ = im2col(x_bf, 3, 3, stride, padding)
    kp1 = _round_up(p1.shape[1], LANE)
    a1 = _pad2d(p1, Mp, kp1)
    b1 = _pad2d(torch_weight_to_mat(params["conv1_w"]), kp1, Cp).astype(jnp.bfloat16)
    y1, st1 = conv_bn_stats(a1, b1, tm)
    mean1, var1 = finalize_stats(st1, M, Cp)
    sc1, sh1 = bn_affine(mean1, var1, params["bn1_g"], params["bn1_b"], Cp)

    # ---- conv2: bn1 affine + LeakyReLU fused into the operand path ----
    # Halo of the raw-y1 image is filled with p = -shift/scale so that the
    # in-kernel affine maps it to exactly 0, matching conv2's zero padding on
    # h1.  (Degenerate bn1 gamma == 0 would fall back to p = 0.)
    y1_img = y1[:M, :Cout].reshape(N, Ho, Wo, Cout)
    scale1 = sc1[0, :Cout]
    shift1 = sh1[0, :Cout]
    safe_scale = jnp.where(scale1 != 0.0, scale1, 1.0)
    pad_val = jnp.where(scale1 != 0.0, -shift1 / safe_scale, 0.0)
    p2, _ = im2col(y1_img, 3, 3, 1, 1, pad_value=pad_val)
    kp2 = _round_up(p2.shape[1], LANE)
    a2 = _pad2d(p2, Mp, kp2)
    b2 = _pad2d(torch_weight_to_mat(params["conv2_w"]), kp2, Cp).astype(jnp.bfloat16)
    # Per-channel scale/shift tiled 9x to the (tap, channel) patch layout.
    sc_vec = _pad2d(jnp.tile(scale1, 9).reshape(1, -1), 1, kp2)
    sh_vec = _pad2d(jnp.tile(shift1, 9).reshape(1, -1), 1, kp2)

    if stride != 1 or Cin != Cout:
        # Downsample path: conv2 and the 1x1 shortcut conv share one kernel.
        pid, _ = im2col(x_bf, 1, 1, stride, 0)
        kpid = _round_up(pid.shape[1], LANE)
        aid = _pad2d(pid, Mp, kpid)
        # The 1x1 conv bias cancels exactly under train-mode BN -> dropped.
        bid = _pad2d(torch_weight_to_mat(params["inc_w"]), kpid, Cp).astype(jnp.bfloat16)
        y2, yid, st2, stid = dual_conv_bn_stats(a2, sc_vec, sh_vec, b2, aid, bid, tm, M)
        mid, vid = finalize_stats(stid, M, Cp)
        scid, shid = bn_affine(mid, vid, params["inc_bn_g"], params["inc_bn_b"], Cp)
        res = yid
    else:
        y2, st2 = conv_bn_stats_fused_in(a2, sc_vec, sh_vec, b2, tm, M)
        res = _pad2d(x_nhwc.reshape(M, Cin), Mp, Cp)   # exact f32 identity
        scid = jnp.ones((1, Cp), jnp.float32)
        shid = jnp.zeros((1, Cp), jnp.float32)

    mean2, var2 = finalize_stats(st2, M, Cp)
    sc2, sh2 = bn_affine(mean2, var2, params["bn2_g"], params["bn2_b"], Cp)

    # bn2(y2) + BN_id(res) -> LeakyReLU, fused in one tiled Pallas pass.
    out = affine_add_act(y2, sc2, sh2, res, scid, shid, tm)
    out = out[:M, :Cout].reshape(N, Ho, Wo, Cout)
    return jnp.transpose(out, (0, 3, 1, 2))  # back to NCHW


def init_params(key, in_channels, out_channels):
    k1, k2, k3, k4 = jax.random.split(key, 4)
    return {
        "conv1_w": 0.1 * jax.random.normal(
            k1, (out_channels, in_channels, 3, 3), jnp.float32),
        "bn1_g": jnp.ones((1, out_channels), jnp.float32),
        "bn1_b": jnp.zeros((1, out_channels), jnp.float32),
        "conv2_w": 0.1 * jax.random.normal(
            k2, (out_channels, out_channels, 3, 3), jnp.float32),
        # nn.init.constant_(self.bn2.weight, 0)
        "bn2_g": jnp.zeros((1, out_channels), jnp.float32),
        "bn2_b": jnp.zeros((1, out_channels), jnp.float32),
        # downsample path (1x1 conv has bias=True by nn.Conv2d default; the
        # bias cancels under train-mode BN so the kernels never consume it)
        "inc_w": 0.1 * jax.random.normal(
            k3, (out_channels, in_channels, 1, 1), jnp.float32),
        "inc_b": 0.1 * jax.random.normal(k4, (out_channels,), jnp.float32),
        "inc_bn_g": jnp.ones((1, out_channels), jnp.float32),
        "inc_bn_b": jnp.zeros((1, out_channels), jnp.float32),
    }


# ---------------------------------------------------------------------------
# Pure-JAX reference (mirrors the PyTorch module in train mode) for self-check
# ---------------------------------------------------------------------------
def reference_forward(x, params, stride, padding):
    def conv(h, w, s, p, bias=None):
        out = jax.lax.conv_general_dilated(
            h, w, window_strides=(s, s), padding=[(p, p), (p, p)],
            dimension_numbers=("NCHW", "OIHW", "NCHW"))
        if bias is not None:
            out = out + bias.reshape(1, -1, 1, 1)
        return out

    def bn(h, g, b):
        mean = jnp.mean(h, axis=(0, 2, 3), keepdims=True)
        var = jnp.mean(jnp.square(h - mean), axis=(0, 2, 3), keepdims=True)
        return ((h - mean) * jax.lax.rsqrt(var + EPS)
                * g.reshape(1, -1, 1, 1) + b.reshape(1, -1, 1, 1))

    def lrelu(h):
        return jnp.where(h >= 0, h, NEG_SLOPE * h)

    Cin = x.shape[1]
    Cout = params["conv1_w"].shape[0]
    identity = x
    h = lrelu(bn(conv(x, params["conv1_w"], stride, padding),
                 params["bn1_g"], params["bn1_b"]))
    h = bn(conv(h, params["conv2_w"], 1, 1), params["bn2_g"], params["bn2_b"])
    if stride != 1 or Cin != Cout:
        identity = bn(conv(x, params["inc_w"], stride, 0, bias=params["inc_b"]),
                      params["inc_bn_g"], params["inc_bn_b"])
    return lrelu(h + identity)


if __name__ == "__main__":
    def run_case(key, N, Cin, H, W, Cout, stride, padding, tm):
        kx, kp = jax.random.split(key)
        # Small offset gives the BN shifts (and the halo pad trick) real work.
        x = jax.random.normal(kx, (N, Cin, H, W), jnp.float32) + 0.25
        params = init_params(kp, Cin, Cout)
        # Module init sets bn2.weight = 0, which would zero out the conv2
        # branch and make the numeric check vacuous -> use a non-trivial gamma.
        params["bn2_g"] = 0.5 * jnp.ones((1, Cout), jnp.float32)

        fwd = jax.jit(functools.partial(
            basic_block_forward, stride=stride, padding=padding, tm=tm))
        out = jax.block_until_ready(fwd(x, params))

        Ho = (H + 2 * padding - 3) // stride + 1
        Wo = (W + 2 * padding - 3) // stride + 1
        assert out.shape == (N, Cout, Ho, Wo), out.shape
        assert bool(jnp.all(jnp.isfinite(out)))
        ref = reference_forward(x, params, stride, padding)
        err = float(jnp.max(jnp.abs(out - ref)))
        assert err < 0.1, f"max abs err vs reference: {err}"

    key = jax.random.PRNGKey(0)
    k1, k2 = jax.random.split(key)
    # Downsample path: stride-2, 4 -> 8 channels (merged conv2 + 1x1 shortcut
    # kernel).  tm=64 forces a multi-step pixel-tile grid at this tiny size.
    run_case(k1, N=2, Cin=4, H=16, W=16, Cout=8, stride=2, padding=1, tm=64)
    # Identity path: stride-1, 8 -> 8 channels (fused conv2 kernel, raw residual).
    run_case(k2, N=2, Cin=8, H=8, W=8, Cout=8, stride=1, padding=1, tm=64)
    print("KERNEL_OK")
</pallas_src>

<mosaic_0001>
module attributes {stable_mosaic.version = 11 : i64} {
  func.func @_matmul_stats_kernel(%arg0: i32, %arg1: memref<64x128xbf16, #tpu.memory_space<vmem>>, %arg2: memref<128x128xbf16, #tpu.memory_space<vmem>>, %arg3: memref<64x128xbf16, #tpu.memory_space<vmem>>, %arg4: memref<8x128xf32, #tpu.memory_space<vmem>>) attributes {dimension_semantics = [#tpu.dimension_semantics<parallel>], iteration_bounds = array<i64: 2>, scalar_prefetch = 0 : i64, scratch_operands = 0 : i64, tpu.core_type = #tpu.core_type<tc>, window_params = [{transform_indices = @transform_0, window_bounds = array<i64: 64, 128>}, {pipeline_mode = #tpu.pipeline_mode<synchronous>, transform_indices = @transform_1, window_bounds = array<i64: 128, 128>}, {transform_indices = @transform_2, window_bounds = array<i64: 64, 128>}, {transform_indices = @transform_3, window_bounds = array<i64: 8, 128>}]} {
    %c0 = arith.constant 0 : index
    %c0_0 = arith.constant 0 : index
    %0 = vector.load %arg1[%c0, %c0_0] : memref<64x128xbf16, #tpu.memory_space<vmem>>, vector<64x128xbf16>
    %c0_1 = arith.constant 0 : index
    %c0_2 = arith.constant 0 : index
    %1 = vector.load %arg2[%c0_1, %c0_2] : memref<128x128xbf16, #tpu.memory_space<vmem>>, vector<128x128xbf16>
    %cst = arith.constant dense<0.000000e+00> : vector<64x128xf32>
    %2 = tpu.matmul %0, %1, %cst {dimension_numbers = #tpu.dot_dimension_numbers<[1], [0], [0], [1], [0, 0, 1, 1], [], []>} : vector<64x128xbf16>, vector<128x128xbf16>, vector<64x128xf32> -> vector<64x128xf32>
    %3 = arith.truncf %2 : vector<64x128xf32> to vector<64x128xbf16>
    %c0_3 = arith.constant 0 : index
    %c0_4 = arith.constant 0 : index
    %4 = vector.load %arg3[%c0_3, %c0_4] : memref<64x128xbf16, #tpu.memory_space<vmem>>, vector<64x128xbf16>
    tpu.vector_store %arg3[%c0_3, %c0_4], %3 {strides = array<i32>} : memref<64x128xbf16, #tpu.memory_space<vmem>>, vector<64x128xbf16>,
    %cst_5 = arith.constant dense<0.000000e+00> : vector<128xf32>
    %5 = vector.multi_reduction <add>, %2, %cst_5 [0] : vector<64x128xf32> to vector<128xf32>
    %6 = vector.shape_cast %5 : vector<128xf32> to vector<1x128xf32>
    %c0_6 = arith.constant 0 : index
    %c0_7 = arith.constant 0 : index
    %7 = vector.load %arg4[%c0_6, %c0_7] : memref<8x128xf32, #tpu.memory_space<vmem>>, vector<1x128xf32>
    tpu.vector_store %arg4[%c0_6, %c0_7], %6 {strides = array<i32>} : memref<8x128xf32, #tpu.memory_space<vmem>>, vector<1x128xf32>,
    %8 = arith.mulf %2, %2 : vector<64x128xf32>
    %cst_8 = arith.constant dense<0.000000e+00> : vector<128xf32>
    %9 = vector.multi_reduction <add>, %8, %cst_8 [0] : vector<64x128xf32> to vector<128xf32>
    %10 = vector.shape_cast %9 : vector<128xf32> to vector<1x128xf32>
    %c1 = arith.constant 1 : index
    %c0_9 = arith.constant 0 : index
    %11 = vector.load %arg4[%c1, %c0_9] : memref<8x128xf32, #tpu.memory_space<vmem>>, vector<1x128xf32>
    tpu.vector_store %arg4[%c1, %c0_9], %10 {strides = array<i32>} : memref<8x128xf32, #tpu.memory_space<vmem>>, vector<1x128xf32>,
    return
  }
  func.func @transform_0(%arg0: i32) -> (i32, i32) {
    %c0_i32 = arith.constant 0 : i32
    %c0_i32_0 = arith.constant 0 : i32
    return %arg0, %c0_i32 : i32, i32
  }
  func.func @transform_1(%arg0: i32) -> (i32, i32) {
    %c0_i32 = arith.constant 0 : i32
    %c0_i32_0 = arith.constant 0 : i32
    %c0_i32_1 = arith.constant 0 : i32
    return %c0_i32, %c0_i32_0 : i32, i32
  }
  func.func @transform_2(%arg0: i32) -> (i32, i32) {
    %c0_i32 = arith.constant 0 : i32
    %c0_i32_0 = arith.constant 0 : i32
    return %arg0, %c0_i32 : i32, i32
  }
  func.func @transform_3(%arg0: i32) -> (i32, i32) {
    %c0_i32 = arith.constant 0 : i32
    %c0_i32_0 = arith.constant 0 : i32
    return %arg0, %c0_i32 : i32, i32
  }
}

module attributes {stable_mosaic.version = 11 : i64} {
  func.func @_affine_add_act_kernel(%arg0: i32, %arg1: memref<64x128xbf16, #tpu.memory_space<vmem>>, %arg2: memref<1x128xf32, #tpu.memory_space<vmem>>, %arg3: memref<1x128xf32, #tpu.memory_space<vmem>>, %arg4: memref<64x128xbf16, #tpu.memory_space<vmem>>, %arg5: memref<1x128xf32, #tpu.memory_space<vmem>>, %arg6: memref<1x128xf32, #tpu.memory_space<vmem>>, %arg7: memref<64x128xf32, #tpu.memory_space<vmem>>) attributes {dimension_semantics = [#tpu.dimension_semantics<parallel>], iteration_bounds = array<i64: 2>, scalar_prefetch = 0 : i64, scratch_operands = 0 : i64, tpu.core_type = #tpu.core_type<tc>, window_params = [{transform_indices = @transform_0, window_bounds = array<i64: 64, 128>}, {pipeline_mode = #tpu.pipeline_mode<synchronous>, transform_indices = @transform_1, window_bounds = array<i64: 1, 128>}, {pipeline_mode = #tpu.pipeline_mode<synchronous>, transform_indices = @transform_2, window_bounds = array<i64: 1, 128>}, {transform_indices = @transform_3, window_bounds = array<i64: 64, 128>}, {pipeline_mode = #tpu.pipeline_mode<synchronous>, transform_indices = @transform_4, window_bounds = array<i64: 1, 128>}, {pipeline_mode = #tpu.pipeline_mode<synchronous>, transform_indices = @transform_5, window_bounds = array<i64: 1, 128>}, {transform_indices = @transform_6, window_bounds = array<i64: 64, 128>}]} {
    %c0 = arith.constant 0 : index
    %c0_0 = arith.constant 0 : index
    %0 = vector.load %arg1[%c0, %c0_0] : memref<64x128xbf16, #tpu.memory_space<vmem>>, vector<64x128xbf16>
    %1 = arith.extf %0 : vector<64x128xbf16> to vector<64x128xf32>
    %c0_1 = arith.constant 0 : index
    %c0_2 = arith.constant 0 : index
    %2 = vector.load %arg2[%c0_1, %c0_2] : memref<1x128xf32, #tpu.memory_space<vmem>>, vector<1x128xf32>
    %3 = vector.broadcast %2 : vector<1x128xf32> to vector<64x128xf32>
    %4 = arith.mulf %1, %3 : vector<64x128xf32>
    %c0_3 = arith.constant 0 : index
    %c0_4 = arith.constant 0 : index
    %5 = vector.load %arg3[%c0_3, %c0_4] : memref<1x128xf32, #tpu.memory_space<vmem>>, vector<1x128xf32>
    %6 = vector.broadcast %5 : vector<1x128xf32> to vector<64x128xf32>
    %7 = arith.addf %4, %6 : vector<64x128xf32>
    %c0_5 = arith.constant 0 : index
    %c0_6 = arith.constant 0 : index
    %8 = vector.load %arg4[%c0_5, %c0_6] : memref<64x128xbf16, #tpu.memory_space<vmem>>, vector<64x128xbf16>
    %9 = arith.extf %8 : vector<64x128xbf16> to vector<64x128xf32>
    %c0_7 = arith.constant 0 : index
    %c0_8 = arith.constant 0 : index
    %10 = vector.load %arg5[%c0_7, %c0_8] : memref<1x128xf32, #tpu.memory_space<vmem>>, vector<1x128xf32>
    %11 = vector.broadcast %10 : vector<1x128xf32> to vector<64x128xf32>
    %12 = arith.mulf %9, %11 : vector<64x128xf32>
    %13 = arith.addf %7, %12 : vector<64x128xf32>
    %c0_9 = arith.constant 0 : index
    %c0_10 = arith.constant 0 : index
    %14 = vector.load %arg6[%c0_9, %c0_10] : memref<1x128xf32, #tpu.memory_space<vmem>>, vector<1x128xf32>
    %15 = vector.broadcast %14 : vector<1x128xf32> to vector<64x128xf32>
    %16 = arith.addf %13, %15 : vector<64x128xf32>
    %cst = arith.constant 0.000000e+00 : f32
    %17 = vector.broadcast %cst : f32 to vector<64x128xf32>
    %18 = arith.cmpf oge, %16, %17 : vector<64x128xf32>
    %cst_11 = arith.constant 0.00999999977 : f32
    %19 = vector.broadcast %cst_11 : f32 to vector<64x128xf32>
    %20 = arith.mulf %19, %16 : vector<64x128xf32>
    %21 = arith.select %18, %16, %20 : vector<64x128xi1>, vector<64x128xf32>
    %c0_12 = arith.constant 0 : index
    %c0_13 = arith.constant 0 : index
    %22 = vector.load %arg7[%c0_12, %c0_13] : memref<64x128xf32, #tpu.memory_space<vmem>>, vector<64x128xf32>
    tpu.vector_store %arg7[%c0_12, %c0_13], %21 {strides = array<i32>} : memref<64x128xf32, #tpu.memory_space<vmem>>, vector<64x128xf32>,
    return
  }
  func.func @transform_0(%arg0: i32) -> (i32, i32) {
    %c0_i32 = arith.constant 0 : i32
    %c0_i32_0 = arith.constant 0 : i32
    return %arg0, %c0_i32 : i32, i32
  }
  func.func @transform_1(%arg0: i32) -> (i32, i32) {
    %c0_i32 = arith.constant 0 : i32
    %c0_i32_0 = arith.constant 0 : i32
    %c0_i32_1 = arith.constant 0 : i32
    return %c0_i32, %c0_i32_0 : i32, i32
  }
  func.func @transform_2(%arg0: i32) -> (i32, i32) {
    %c0_i32 = arith.constant 0 : i32
    %c0_i32_0 = arith.constant 0 : i32
    %c0_i32_1 = arith.constant 0 : i32
    return %c0_i32, %c0_i32_0 : i32, i32
  }
  func.func @transform_3(%arg0: i32) -> (i32, i32) {
    %c0_i32 = arith.constant 0 : i32
    %c0_i32_0 = arith.constant 0 : i32
    return %arg0, %c0_i32 : i32, i32
  }
  func.func @transform_4(%arg0: i32) -> (i32, i32) {
    %c0_i32 = arith.constant 0 : i32
    %c0_i32_0 = arith.constant 0 : i32
    %c0_i32_1 = arith.constant 0 : i32
    return %c0_i32, %c0_i32_0 : i32, i32
  }
  func.func @transform_5(%arg0: i32) -> (i32, i32) {
    %c0_i32 = arith.constant 0 : i32
    %c0_i32_0 = arith.constant 0 : i32
    %c0_i32_1 = arith.constant 0 : i32
    return %c0_i32, %c0_i32_0 : i32, i32
  }
  func.func @transform_6(%arg0: i32) -> (i32, i32) {
    %c0_i32 = arith.constant 0 : i32
    %c0_i32_0 = arith.constant 0 : i32
    return %arg0, %c0_i32 : i32, i32
  }
}

module attributes {stable_mosaic.version = 11 : i64} {
  func.func @_dual_affmm_stats_kernel(%arg0: i32, %arg1: memref<64x128xbf16, #tpu.memory_space<vmem>>, %arg2: memref<1x128xf32, #tpu.memory_space<vmem>>, %arg3: memref<1x128xf32, #tpu.memory_space<vmem>>, %arg4: memref<128x128xbf16, #tpu.memory_space<vmem>>, %arg5: memref<64x128xbf16, #tpu.memory_space<vmem>>, %arg6: memref<128x128xbf16, #tpu.memory_space<vmem>>, %arg7: memref<64x128xbf16, #tpu.memory_space<vmem>>, %arg8: memref<64x128xbf16, #tpu.memory_space<vmem>>, %arg9: memref<8x128xf32, #tpu.memory_space<vmem>>, %arg10: memref<8x128xf32, #tpu.memory_space<vmem>>) attributes {dimension_semantics = [#tpu.dimension_semantics<parallel>], iteration_bounds = array<i64: 2>, scalar_prefetch = 0 : i64, scratch_operands = 0 : i64, tpu.core_type = #tpu.core_type<tc>, window_params = [{transform_indices = @transform_0, window_bounds = array<i64: 64, 128>}, {pipeline_mode = #tpu.pipeline_mode<synchronous>, transform_indices = @transform_1, window_bounds = array<i64: 1, 128>}, {pipeline_mode = #tpu.pipeline_mode<synchronous>, transform_indices = @transform_2, window_bounds = array<i64: 1, 128>}, {pipeline_mode = #tpu.pipeline_mode<synchronous>, transform_indices = @transform_3, window_bounds = array<i64: 128, 128>}, {transform_indices = @transform_4, window_bounds = array<i64: 64, 128>}, {pipeline_mode = #tpu.pipeline_mode<synchronous>, transform_indices = @transform_5, window_bounds = array<i64: 128, 128>}, {transform_indices = @transform_6, window_bounds = array<i64: 64, 128>}, {transform_indices = @transform_7, window_bounds = array<i64: 64, 128>}, {transform_indices = @transform_8, window_bounds = array<i64: 8, 128>}, {transform_indices = @transform_9, window_bounds = array<i64: 8, 128>}]} {
    %c0 = arith.constant 0 : index
    %c0_0 = arith.constant 0 : index
    %0 = vector.load %arg1[%c0, %c0_0] : memref<64x128xbf16, #tpu.memory_space<vmem>>, vector<64x128xbf16>
    %1 = arith.extf %0 : vector<64x128xbf16> to vector<64x128xf32>
    %c0_1 = arith.constant 0 : index
    %c0_2 = arith.constant 0 : index
    %2 = vector.load %arg2[%c0_1, %c0_2] : memref<1x128xf32, #tpu.memory_space<vmem>>, vector<1x128xf32>
    %3 = vector.broadcast %2 : vector<1x128xf32> to vector<64x128xf32>
    %4 = arith.mulf %1, %3 : vector<64x128xf32>
    %c0_3 = arith.constant 0 : index
    %c0_4 = arith.constant 0 : index
    %5 = vector.load %arg3[%c0_3, %c0_4] : memref<1x128xf32, #tpu.memory_space<vmem>>, vector<1x128xf32>
    %6 = vector.broadcast %5 : vector<1x128xf32> to vector<64x128xf32>
    %7 = arith.addf %4, %6 : vector<64x128xf32>
    %cst = arith.constant 0.000000e+00 : f32
    %8 = vector.broadcast %cst : f32 to vector<64x128xf32>
    %9 = arith.cmpf oge, %7, %8 : vector<64x128xf32>
    %cst_5 = arith.constant 0.00999999977 : f32
    %10 = vector.broadcast %cst_5 : f32 to vector<64x128xf32>
    %11 = arith.mulf %10, %7 : vector<64x128xf32>
    %12 = arith.select %9, %7, %11 : vector<64x128xi1>, vector<64x128xf32>
    %13 = arith.truncf %12 : vector<64x128xf32> to vector<64x128xbf16>
    %c0_6 = arith.constant 0 : index
    %c0_7 = arith.constant 0 : index
    %14 = vector.load %arg4[%c0_6, %c0_7] : memref<128x128xbf16, #tpu.memory_space<vmem>>, vector<128x128xbf16>
    %cst_8 = arith.constant dense<0.000000e+00> : vector<64x128xf32>
    %15 = tpu.matmul %13, %14, %cst_8 {dimension_numbers = #tpu.dot_dimension_numbers<[1], [0], [0], [1], [0, 0, 1, 1], [], []>} : vector<64x128xbf16>, vector<128x128xbf16>, vector<64x128xf32> -> vector<64x128xf32>
    %16 = arith.truncf %15 : vector<64x128xf32> to vector<64x128xbf16>
    %c0_9 = arith.constant 0 : index
    %c0_10 = arith.constant 0 : index
    %17 = vector.load %arg7[%c0_9, %c0_10] : memref<64x128xbf16, #tpu.memory_space<vmem>>, vector<64x128xbf16>
    tpu.vector_store %arg7[%c0_9, %c0_10], %16 {strides = array<i32>} : memref<64x128xbf16, #tpu.memory_space<vmem>>, vector<64x128xbf16>,
    %18 = tpu.iota {dimensions = array<i32: 0>} : vector<64x1xi32>
    %c64_i32 = arith.constant 64 : i32
    %19 = arith.muli %arg0, %c64_i32 : i32
    %20 = vector.broadcast %19 : i32 to vector<64x1xi32>
    %21 = arith.addi %18, %20 : vector<64x1xi32>
    %c128_i32 = arith.constant 128 : i32
    %22 = vector.broadcast %c128_i32 : i32 to vector<64x1xi32>
    %23 = arith.cmpi slt, %21, %22 : vector<64x1xi32>
    %cst_11 = arith.constant 0.000000e+00 : f32
    %24 = vector.shape_cast %23 : vector<64x1xi1> to vector<64x1xi1>
    %25 = vector.broadcast %24 : vector<64x1xi1> to vector<64x128xi1>
    %26 = vector.broadcast %cst_11 : f32 to vector<64x128xf32>
    %27 = arith.select %25, %15, %26 : vector<64x128xi1>, vector<64x128xf32>
    %cst_12 = arith.constant dense<0.000000e+00> : vector<128xf32>
    %28 = vector.multi_reduction <add>, %27, %cst_12 [0] : vector<64x128xf32> to vector<128xf32>
    %29 = vector.shape_cast %28 : vector<128xf32> to vector<1x128xf32>
    %c0_13 = arith.constant 0 : index
    %c0_14 = arith.constant 0 : index
    %30 = vector.load %arg9[%c0_13, %c0_14] : memref<8x128xf32, #tpu.memory_space<vmem>>, vector<1x128xf32>
    tpu.vector_store %arg9[%c0_13, %c0_14], %29 {strides = array<i32>} : memref<8x128xf32, #tpu.memory_space<vmem>>, vector<1x128xf32>,
    %31 = arith.mulf %27, %27 : vector<64x128xf32>
    %cst_15 = arith.constant dense<0.000000e+00> : vector<128xf32>
    %32 = vector.multi_reduction <add>, %31, %cst_15 [0] : vector<64x128xf32> to vector<128xf32>
    %33 = vector.shape_cast %32 : vector<128xf32> to vector<1x128xf32>
    %c1 = arith.constant 1 : index
    %c0_16 = arith.constant 0 : index
    %34 = vector.load %arg9[%c1, %c0_16] : memref<8x128xf32, #tpu.memory_space<vmem>>, vector<1x128xf32>
    tpu.vector_store %arg9[%c1, %c0_16], %33 {strides = array<i32>} : memref<8x128xf32, #tpu.memory_space<vmem>>, vector<1x128xf32>,
    %c0_17 = arith.constant 0 : index
    %c0_18 = arith.constant 0 : index
    %35 = vector.load %arg5[%c0_17, %c0_18] : memref<64x128xbf16, #tpu.memory_space<vmem>>, vector<64x128xbf16>
    %c0_19 = arith.constant 0 : index
    %c0_20 = arith.constant 0 : index
    %36 = vector.load %arg6[%c0_19, %c0_20] : memref<128x128xbf16, #tpu.memory_space<vmem>>, vector<128x128xbf16>
    %cst_21 = arith.constant dense<0.000000e+00> : vector<64x128xf32>
    %37 = tpu.matmul %35, %36, %cst_21 {dimension_numbers = #tpu.dot_dimension_numbers<[1], [0], [0], [1], [0, 0, 1, 1], [], []>} : vector<64x128xbf16>, vector<128x128xbf16>, vector<64x128xf32> -> vector<64x128xf32>
    %38 = arith.truncf %37 : vector<64x128xf32> to vector<64x128xbf16>
    %c0_22 = arith.constant 0 : index
    %c0_23 = arith.constant 0 : index
    %39 = vector.load %arg8[%c0_22, %c0_23] : memref<64x128xbf16, #tpu.memory_space<vmem>>, vector<64x128xbf16>
    tpu.vector_store %arg8[%c0_22, %c0_23], %38 {strides = array<i32>} : memref<64x128xbf16, #tpu.memory_space<vmem>>, vector<64x128xbf16>,
    %cst_24 = arith.constant dense<0.000000e+00> : vector<128xf32>
    %40 = vector.multi_reduction <add>, %37, %cst_24 [0] : vector<64x128xf32> to vector<128xf32>
    %41 = vector.shape_cast %40 : vector<128xf32> to vector<1x128xf32>
    %c0_25 = arith.constant 0 : index
    %c0_26 = arith.constant 0 : index
    %42 = vector.load %arg10[%c0_25, %c0_26] : memref<8x128xf32, #tpu.memory_space<vmem>>, vector<1x128xf32>
    tpu.vector_store %arg10[%c0_25, %c0_26], %41 {strides = array<i32>} : memref<8x128xf32, #tpu.memory_space<vmem>>, vector<1x128xf32>,
    %43 = arith.mulf %37, %37 : vector<64x128xf32>
    %cst_27 = arith.constant dense<0.000000e+00> : vector<128xf32>
    %44 = vector.multi_reduction <add>, %43, %cst_27 [0] : vector<64x128xf32> to vector<128xf32>
    %45 = vector.shape_cast %44 : vector<128xf32> to vector<1x128xf32>
    %c1_28 = arith.constant 1 : index
    %c0_29 = arith.constant 0 : index
    %46 = vector.load %arg10[%c1_28, %c0_29] : memref<8x128xf32, #tpu.memory_space<vmem>>, vector<1x128xf32>
    tpu.vector_store %arg10[%c1_28, %c0_29], %45 {strides = array<i32>} : memref<8x128xf32, #tpu.memory_space<vmem>>, vector<1x128xf32>,
    return
  }
  func.func @transform_0(%arg0: i32) -> (i32, i32) {
    %c0_i32 = arith.constant 0 : i32
    %c0_i32_0 = arith.constant 0 : i32
    return %arg0, %c0_i32 : i32, i32
  }
  func.func @transform_1(%arg0: i32) -> (i32, i32) {
    %c0_i32 = arith.constant 0 : i32
    %c0_i32_0 = arith.constant 0 : i32
    %c0_i32_1 = arith.constant 0 : i32
    return %c0_i32, %c0_i32_0 : i32, i32
  }
  func.func @transform_2(%arg0: i32) -> (i32, i32) {
    %c0_i32 = arith.constant 0 : i32
    %c0_i32_0 = arith.constant 0 : i32
    %c0_i32_1 = arith.constant 0 : i32
    return %c0_i32, %c0_i32_0 : i32, i32
  }
  func.func @transform_3(%arg0: i32) -> (i32, i32) {
    %c0_i32 = arith.constant 0 : i32
    %c0_i32_0 = arith.constant 0 : i32
    %c0_i32_1 = arith.constant 0 : i32
    return %c0_i32, %c0_i32_0 : i32, i32
  }
  func.func @transform_4(%arg0: i32) -> (i32, i32) {
    %c0_i32 = arith.constant 0 : i32
    %c0_i32_0 = arith.constant 0 : i32
    return %arg0, %c0_i32 : i32, i32
  }
  func.func @transform_5(%arg0: i32) -> (i32, i32) {
    %c0_i32 = arith.constant 0 : i32
    %c0_i32_0 = arith.constant 0 : i32
    %c0_i32_1 = arith.constant 0 : i32
    return %c0_i32, %c0_i32_0 : i32, i32
  }
  func.func @transform_6(%arg0: i32) -> (i32, i32) {
    %c0_i32 = arith.constant 0 : i32
    %c0_i32_0 = arith.constant 0 : i32
    return %arg0, %c0_i32 : i32, i32
  }
  func.func @transform_7(%arg0: i32) -> (i32, i32) {
    %c0_i32 = arith.constant 0 : i32
    %c0_i32_0 = arith.constant 0 : i32
    return %arg0, %c0_i32 : i32, i32
  }
  func.func @transform_8(%arg0: i32) -> (i32, i32) {
    %c0_i32 = arith.constant 0 : i32
    %c0_i32_0 = arith.constant 0 : i32
    return %arg0, %c0_i32 : i32, i32
  }
  func.func @transform_9(%arg0: i32) -> (i32, i32) {
    %c0_i32 = arith.constant 0 : i32
    %c0_i32_0 = arith.constant 0 : i32
    return %arg0, %c0_i32 : i32, i32
  }
}

</mosaic_0001>

<bundles_post_ra>
// kernel: tile.14
= control target key start
LH: loop header
LB: loop body
LE: loop exit
PB: predicated region body
PF: predicated region fallthrough
CT: control target
= control target key end

     0   :  { %s28_s0 = inlined_call_operand.vmem [shape: f32[8], index: 0, kind: input, shape index: {}]   ;;  %s29_s1 = inlined_call_operand.vmem [shape: f32[9,8], index: 1, kind: output, shape index: {}]  }
   0x1   :  { %v4_v0 = vld [vmem:[%s28_s0] ss:$0 sm:$0xff] }
   0x2   :  { %5 = vst [vmem:[%s29_s1] sm:$0xff] %v4_v0 }
   0x3   :  { %8 = vst [vmem:[%s29_s1 + $0x8] sm:$0xff] %v4_v0 }

// kernel: tile.15
= control target key start
LH: loop header
LB: loop body
LE: loop exit
PB: predicated region body
PF: predicated region fallthrough
CT: control target
= control target key end

     0   :  { %s75_s10 = smov 64   ;;  %s76_s11 = smov 48   ;;  %vm3_vm0 = vcmask 64512   ;;  %vm9_vm1 = vcmask 589312   ;;  %vm15_vm2 = vcmask 523712   ;;  %vm21_vm3 = vcmask 458112   ;;  %s123_s0 = inlined_call_operand.vmem [shape: f32[9,8], index: 0, kind: input, shape index: {}]   ;;  %s124_s1 = inlined_call_operand.vmem [shape: f32[1,72], index: 1, kind: output, shape index: {}]  }
   0x1   :  { %v59_v0 = vld [vmem:[%s123_s0 + $0x8] sm:$0x1]   ;;  %v61_v1 = vld [vmem:[%s123_s0 + $0x6] sm:$0x1]   ;;  %v63_v2 = vld [vmem:[%s123_s0 + $0x4] sm:$0x1]  }
   0x2   :  { %7 = vrot.lane.b32.xlu0 %v59_v0, %s75_s10  ;;  %19 = vrot.lane.b32.xlu1 %v61_v1, %s76_s11  ;;  %s77_s14 = smov 32   ;;  %v60_v3 = vld [vmem:[%s123_s0 + $0x7] sm:$0x1]   ;;  %v62_v4 = vld [vmem:[%s123_s0 + $0x5] sm:$0x1]   ;;  %s78_s19 = smov 56  }
   0x3   :  { %31 = vrot.lane.b32.xlu2 %v63_v2, %s77_s14  ;;  %s79_s20 = smov 40   ;;  %v64_v5 = vld [vmem:[%s123_s0 + $0x3] sm:$0x1]   ;;  %s80_s23 = smov 24   ;;  %v65_v6 = vld [vmem:[%s123_s0 + $0x2] sm:$0x1]  }
   0x4   :  { %v66_v7 = vld [vmem:[%s123_s0 + $0x1] sm:$0x1]   ;;  %s81_s28 = smov 16   ;;  %s82_s29 = smov 8   ;;  %v2_v8 = vld [vmem:[%s123_s0] sm:$0x1]  }
   0x5   :  { %4 = vst.msk [vmem:[#allocation0] sm:$0x1] %vm3_vm0, %v2_v8   ;;  %vm27_vm4 = vcmask 392512   ;;  %vm33_vm5 = vcmask 326912   ;;  %vm39_vm6 = vcmask 261312   ;;  %vm45_vm7 = vcmask 195712  }
   0x6   :  { %vm51_vm8 = vcmask 130112  }
   0xa   :  { %13 = vrot.lane.b32.xlu0 %v60_v3, %s78_s19  ;;  %25 = vrot.lane.b32.xlu1 %v62_v4, %s79_s20 }
   0xb   :  { %37 = vrot.lane.b32.xlu2 %v64_v5, %s80_s23 }
  0x12   :  { %43 = vrot.lane.b32.xlu0 %v65_v6, %s81_s28  ;;  %49 = vrot.lane.b32.xlu1 %v66_v7, %s82_s29 }
  0x5d   :  { %v32_v9 = vpop.permute.xlu2 %31  }
  0x65   :  { %v38_v10 = vpop.permute.xlu2 %37  }
  0x74   :  { %v8_v11 = vpop.permute.xlu0 %7   ;;  %v20_v12 = vpop.permute.xlu1 %19  }
  0x75   :  { %10 = vst.msk [vmem:[#allocation0] sm:$0x1] %vm9_vm1, %v8_v11  }
  0x7c   :  { %v14_v13 = vpop.permute.xlu0 %13   ;;  %v26_v14 = vpop.permute.xlu1 %25  }
  0x7d   :  { %16 = vst.msk [vmem:[#allocation0] sm:$0x1] %vm15_vm2, %v14_v13  }
  0x7e   :  { %22 = vst.msk [vmem:[#allocation0] sm:$0x1] %vm21_vm3, %v20_v12  }
  0x7f   :  { %28 = vst.msk [vmem:[#allocation0] sm:$0x1] %vm27_vm4, %v26_v14  }
  0x80   :  { %34 = vst.msk [vmem:[#allocation0] sm:$0x1] %vm33_vm5, %v32_v9  }
  0x81   :  { %40 = vst.msk [vmem:[#allocation0] sm:$0x1] %vm39_vm6, %v38_v10  }
  0x84   :  { %v44_v15 = vpop.permute.xlu0 %43   ;;  %v50_v16 = vpop.permute.xlu1 %49  }
  0x85   :  { %46 = vst.msk [vmem:[#allocation0] sm:$0x1] %vm45_vm7, %v44_v15  }
  0x86   :  { %52 = vst.msk [vmem:[#allocation0] sm:$0x1] %vm51_vm8, %v50_v16  }
  0x8d   :  { %v55_v17 = vld [vmem:[#allocation0] sm:$0x1] }
  0x8e   :  { %58 = vst [vmem:[%s124_s1] sm:$0x1] %v55_v17 }

// kernel: basic_block_forward.3
= control target key start
LH: loop header
LB: loop body
LE: loop exit
PB: predicated region body
PF: predicated region fallthrough
CT: control target
= control target key end

     0   :  { %s604_s12 = smov 0   ;;  %s656_s0 = inlined_call_operand.vmem [shape: bf16[128,128], index: 0, kind: input, shape index: {}]   ;;  %s657_s1 = inlined_call_operand.vmem [shape: bf16[128,128], index: 1, kind: input, shape index: {}]   ;;  %s658_s2 = inlined_call_operand.vmem [shape: bf16[128,128], index: 2, kind: output, shape index: {0}]   ;;  %s659_s3 = inlined_call_operand.vmem [shape: f32[16,128], index: 3, kind: output, shape index: {1}]  }
   0x1 LB: > { %s610_s13 = sadd.s32 4294967295, %s582_s12   ;;  %p453_p0 = scmp.ge.s32.totalorder %s582_s12, 1  ;;  %s582_s12 = sphi %s604_s12, %s14_s12  }
   0x2   : > { %p141_p1 = scmp.lt.s32.totalorder %s582_s12, 3 }
   0x4   : > { %p142_p2 = pnand %p453_p0, %p141_p1 }
   0x5   : > { %s454_s22 = sshll.u32 (!%p142_p2), %s610_s13, 3  ;;  %p181_p4 = scmp.lt.s32.totalorder (!%p142_p2), %s610_s13, 1 }
   0x6   : > { %145 = sbr.rel (%p142_p2) target bundleno = 206 (0xce), region = 28  ;;  %p170_p3 = scmp.lt.s32.totalorder (!%p142_p2), %s454_s22, 15 }
   0xb   : > { %v520_v0 = vld [vmem:[%s657_s1 + $0x38] sm:$0xff]  ;;  %v519_v1 = vld [vmem:[%s657_s1 + $0x30] sm:$0xff]  ;;  %v518_v2 = vld [vmem:[%s657_s1 + $0x28] sm:$0xff]  ;;  %s661_s22 = smov (!%p170_p3, %s454_s22), 15  ;;  %s663_s13 = smov (!%p181_p4, %s610_s13), 1 }
   0xc   : > { %281 = vmatpush.bf16.msra.mxu0 %v520_v0  ;;  %544 = vmatpush.bf16.msra.mxu1 %v520_v0  ;;  %v517_v3 = vld [vmem:[%s657_s1 + $0x20] sm:$0xff]  ;;  %v516_v4 = vld [vmem:[%s657_s1 + $0x18] sm:$0xff]  ;;  %v515_v5 = vld [vmem:[%s657_s1 + $0x10] sm:$0xff]  ;;  %s455_s29 = sshll.u32 %s661_s22, 2  ;;  %s458_s11 = sshll.u32 %s663_s13, 3 }
   0xd   : > { %545 = vmatpush.bf16.msra.mxu2 %v520_v0  ;;  %546 = vmatpush.bf16.msra.mxu3 %v520_v0  ;;  %v514_v6 = vld [vmem:[%s657_s1 + $0x8] sm:$0xff]  ;;  %v513_v7 = vld [vmem:[%s657_s1] sm:$0xff]  ;;  %s173_s7 = scalar_lea.vmem %s656_s0, %s455_s29  ;;  %s179_s10 = scalar_lea.vmem %s658_s2, %s455_s29 }
   0xe   : > { %v509_v8 = vld [vmem:[%s173_s7] sm:$0xff]  ;;  %v510_v9 = vld [vmem:[%s173_s7 + $0x8] sm:$0xff]  ;;  %v511_v10 = vld [vmem:[%s173_s7 + $0x10] sm:$0xff]  ;;  %s184_s16 = scalar_lea.vmem %s659_s3, %s458_s11 }
   0xf   : > { %v512_v11 = vld [vmem:[%s173_s7 + $0x18] sm:$0xff] }
  0x10   : > { %282 = vmatpush.bf16.msra.mxu0 %v519_v1  ;;  %547 = vmatpush.bf16.msra.mxu1 %v519_v1 }
  0x11   : > { %548 = vmatpush.bf16.msra.mxu2 %v519_v1  ;;  %549 = vmatpush.bf16.msra.mxu3 %v519_v1 }
  0x14   : > { %283 = vmatpush.bf16.msra.mxu0 %v518_v2  ;;  %550 = vmatpush.bf16.msra.mxu1 %v518_v2 }
  0x15   : > { %551 = vmatpush.bf16.msra.mxu2 %v518_v2  ;;  %552 = vmatpush.bf16.msra.mxu3 %v518_v2 }
  0x18   : > { %284 = vmatpush.bf16.msra.mxu0 %v517_v3  ;;  %553 = vmatpush.bf16.msra.mxu1 %v517_v3 }
  0x19   : > { %554 = vmatpush.bf16.msra.mxu2 %v517_v3  ;;  %555 = vmatpush.bf16.msra.mxu3 %v517_v3 }
  0x1c   : > { %285 = vmatpush.bf16.msra.mxu0 %v516_v4  ;;  %556 = vmatpush.bf16.msra.mxu1 %v516_v4 }
  0x1d   : > { %557 = vmatpush.bf16.msra.mxu2 %v516_v4  ;;  %558 = vmatpush.bf16.msra.mxu3 %v516_v4 }
  0x20   : > { %286 = vmatpush.bf16.msra.mxu0 %v515_v5  ;;  %559 = vmatpush.bf16.msra.mxu1 %v515_v5 }
  0x21   : > { %560 = vmatpush.bf16.msra.mxu2 %v515_v5  ;;  %561 = vmatpush.bf16.msra.mxu3 %v515_v5 }
  0x24   : > { %287 = vmatpush.bf16.msra.mxu0 %v514_v6  ;;  %562 = vmatpush.bf16.msra.mxu1 %v514_v6 }
  0x25   : > { %563 = vmatpush.bf16.msra.mxu2 %v514_v6  ;;  %564 = vmatpush.bf16.msra.mxu3 %v514_v6 }
  0x28   : > { %288 = vmatpush.bf16.msra.mxu0 %v513_v7  ;;  %565 = vmatpush.bf16.msra.mxu1 %v513_v7 }
  0x29   : > { %566 = vmatpush.bf16.msra.mxu2 %v513_v7  ;;  %567 = vmatpush.bf16.msra.mxu3 %v513_v7 }
  0x2b   : > { %289 = vmatmul.bf16.vlgmr.msra.gmra.mxu0 %v509_v8  ;;  %294 = vmatmul.bf16.vlgmr.msra.gmra.mxu1 %v510_v9 }
  0x2c   : > { %299 = vmatmul.bf16.vlgmr.msra.gmra.mxu2 %v511_v10  ;;  %304 = vmatmul.bf16.vlgmr.msra.gmra.mxu3 %v512_v11 }
  0xa8   : > { %v290_v12 = vpop.f32.mrf.mxu0  ;;  %v295_v13 = vpop.f32.mrf.mxu1 }
  0xa9   : > { %v340_v16 = vmul.f32 %v290_v12, %v290_v12  ;;  %v342_v23 = vmul.f32 %v295_v13, %v295_v13 }
  0xaf   : > { %v300_v14 = vpop.f32.mrf.mxu2  ;;  %v305_v15 = vpop.f32.mrf.mxu3 }
  0xb0   : > { %v292_v17 = vpop.f32.mrf.mxu0  ;;  %v297_v18 = vpop.f32.mrf.mxu1  ;;  %v344_v29 = vmul.f32 %v300_v14, %v300_v14  ;;  %v346_v39 = vmul.f32 %v305_v15, %v305_v15 }
  0xb1   : > { %v524_v19 = vpack.c.bf16 %v292_v17, %v290_v12  ;;  %v326_v20 = vadd.f32 %v292_v17, %v290_v12  ;;  %v341_v21 = vmul.f32 %v292_v17, %v292_v17  ;;  %v529_v22 = vpack.c.bf16 %v297_v18, %v295_v13 }
  0xb2   : > { %v343_v27 = vmul.f32 %v297_v18, %v297_v18 }
  0xb3   : > { %525 = vst [vmem:[%s179_s10] sm:$0xff] %v524_v19   ;;  %v348_v24 = vadd.f32 %v341_v21, %v340_v16  ;;  %v327_v25 = vadd.f32 %v326_v20, %v295_v13 }
  0xb4   : > { %541 = vst [vmem:[%s179_s10 + $0x8] sm:$0xff] %v529_v22  }
  0xb5   : > { %v328_v26 = vadd.f32 %v327_v25, %v297_v18  ;;  %v349_v28 = vadd.f32 %v348_v24, %v342_v23 }
  0xb7   : > { %v350_v30 = vadd.f32 %v349_v28, %v343_v27  ;;  %v302_v31 = vpop.f32.mrf.mxu2  ;;  %v329_v32 = vadd.f32 %v328_v26, %v300_v14  ;;  %v307_v33 = vpop.f32.mrf.mxu3 }
  0xb8   : > { %v534_v34 = vpack.c.bf16 %v302_v31, %v300_v14  ;;  %v539_v35 = vpack.c.bf16 %v307_v33, %v305_v15  ;;  %v345_v37 = vmul.f32 %v302_v31, %v302_v31  ;;  %v347_v43 = vmul.f32 %v307_v33, %v307_v33 }
  0xb9   : > { %v330_v36 = vadd.f32 %v329_v32, %v302_v31  ;;  %v351_v38 = vadd.f32 %v350_v30, %v344_v29 }
  0xba   : > { %542 = vst [vmem:[%s179_s10 + $0x10] sm:$0xff] %v534_v34  }
  0xbb   : > { %v352_v40 = vadd.f32 %v351_v38, %v345_v37  ;;  %543 = vst [vmem:[%s179_s10 + $0x18] sm:$0xff] %v539_v35   ;;  %v331_v41 = vadd.f32 %v330_v36, %v305_v15 }
  0xbd   : > { %v332_v42 = vadd.f32 %v331_v41, %v307_v33  ;;  %v353_v44 = vadd.f32 %v352_v40, %v346_v39 }
  0xbf   : > { %v333_v45 = vrot.slane %v332_v42, 4  ;;  %v354_v46 = vadd.f32 %v353_v44, %v347_v43 }
  0xc1   : > { %v334_v47 = vadd.f32 %v333_v45, %v332_v42  ;;  %v355_v48 = vrot.slane %v354_v46, 4 }
  0xc3   : > { %v335_v49 = vrot.slane %v334_v47, 2  ;;  %v356_v50 = vadd.f32 %v355_v48, %v354_v46 }
  0xc5   : > { %v336_v51 = vadd.f32 %v335_v49, %v334_v47  ;;  %v357_v52 = vrot.slane %v356_v50, 2 }
  0xc7   : > { %v337_v53 = vrot.slane %v336_v51, 1  ;;  %v358_v54 = vadd.f32 %v357_v52, %v356_v50 }
  0xc9   : > { %v338_v55 = vadd.f32 %v337_v53, %v336_v51  ;;  %v359_v56 = vrot.slane %v358_v54, 1 }
  0xcb   : > { %339 = vst [vmem:[%s184_s16] sm:$0x1] %v338_v55  ;;  %v360_v57 = vadd.f32 %v359_v56, %v358_v54 }
  0xcd   : > { %361 = vst [vmem:[%s184_s16 + $0x1] sm:$0x1] %v360_v57 }
  0xce PF: > { %s14_s12 = sadd.s32 1, %s582_s12  }
  0xcf   : > { %p11_p5 = scmp.ge.s32.totalorder %s14_s12, 4  }
  0xd1   :  { %13 = sbr.rel (!%p11_p5) target bundleno = 1 (0x1), region = 70 }

// kernel: basic_block_forward.5
= control target key start
LH: loop header
LB: loop body
LE: loop exit
PB: predicated region body
PF: predicated region fallthrough
CT: control target
= control target key end

     0   :  { %s571_s21 = smov 0   ;;  %s669_s0 = inlined_call_operand.vmem [shape: bf16[128,128], index: 0, kind: input, shape index: {}]   ;;  %s670_s1 = inlined_call_operand.vmem [shape: f32[1,128], index: 1, kind: input, shape index: {}]   ;;  %s671_s2 = inlined_call_operand.vmem [shape: f32[1,128], index: 2, kind: input, shape index: {}]   ;;  %s672_s3 = inlined_call_operand.vmem [shape: bf16[128,128], index: 3, kind: input, shape index: {}]   ;;  %s673_s4 = inlined_call_operand.vmem [shape: f32[1,128], index: 4, kind: input, shape index: {}]   ;;  %s674_s5 = inlined_call_operand.vmem [shape: f32[1,128], index: 5, kind: input, shape index: {}]   ;;  %s675_s6 = inlined_call_operand.vmem [shape: f32[128,128], index: 6, kind: output, shape index: {}]  }
   0x1 LB: > { %s465_s22 = sadd.s32 4294967295, %s534_s21   ;;  %p469_p0 = scmp.ge.s32.totalorder %s534_s21, 1  ;;  %s534_s21 = sphi %s571_s21, %s16_s21  }
   0x2   : > { %p224_p1 = scmp.lt.s32.totalorder %s534_s21, 3 }
   0x4   : > { %p225_p2 = pnand %p469_p0, %p224_p1 }
   0x5   : > { %s470_s23 = sshll.u32 (!%p225_p2), %s465_s22, 3 }
   0x6   : > { %228 = sbr.rel (%p225_p2) target bundleno = 43 (0x2b), region = 44  ;;  %p260_p3 = scmp.lt.s32.totalorder (!%p225_p2), %s470_s23, 15 }
   0xb   : > { %s677_s23 = smov (!%p260_p3, %s470_s23), 15  ;;  %v595_v0 = vld [vmem:[%s670_s1] ss:$0 sm:$0xff] }
   0xc   : > { %s471_s24 = sshll.u32 %s677_s23, 2  ;;  %v600_v1 = vld [vmem:[%s673_s4] ss:$0 sm:$0xff]  ;;  %s475_s15 = sshll.u32 %s677_s23, 3 }
   0xd   : > { %s585_s27 = scalar_lea.vmem %s669_s0, %s471_s24  ;;  %s590_s30 = scalar_lea.vmem %s672_s3, %s471_s24  ;;  %v608_v6 = vld [vmem:[%s671_s2] ss:$0 sm:$0xff] }
   0xe   : > { %v479_v2 = vld [vmem:[%s585_s27] sm:$0xff]   ;;  %v510_v4 = vld [vmem:[%s585_s27 + $0x8] sm:$0xff]   ;;  %v511_v15 = vld [vmem:[%s585_s27 + $0x10] sm:$0xff]   ;;  %s646_s18 = scalar_lea.vmem %s675_s6, %s475_s15 }
   0xf   : > { %v495_v3 = vld [vmem:[%s590_s30] sm:$0xff]   ;;  %v480_v5 = vunpack.c.l.bf16 %v479_v2  ;;  %v481_v8 = vunpack.c.h.bf16 %v479_v2  ;;  %v513_v10 = vld [vmem:[%s590_s30 + $0x8] sm:$0xff]   ;;  %v484_v11 = vunpack.c.l.bf16 %v510_v4  ;;  %v485_v13 = vunpack.c.h.bf16 %v510_v4  ;;  %v514_v16 = vld [vmem:[%s590_s30 + $0x10] sm:$0xff]  }
  0x10   : > { %v496_v7 = vunpack.c.l.bf16 %v495_v3  ;;  %v497_v9 = vunpack.c.h.bf16 %v495_v3  ;;  %v500_v12 = vunpack.c.l.bf16 %v513_v10  ;;  %v501_v14 = vunpack.c.h.bf16 %v513_v10  ;;  %v625_v26 = vld [vmem:[%s674_s5] ss:$0 sm:$0xff]  ;;  %v512_v34 = vld [vmem:[%s585_s27 + $0x18] sm:$0xff]  }
  0x11   : > { %v297_v17 = vmul.f32 %v595_v0, %v480_v5  ;;  %v298_v19 = vmul.f32 %v595_v0, %v481_v8  ;;  %v299_v21 = vmul.f32 %v595_v0, %v484_v11  ;;  %v300_v23 = vmul.f32 %v595_v0, %v485_v13  ;;  %v515_v39 = vld [vmem:[%s590_s30 + $0x18] sm:$0xff]  }
  0x12   : > { %v337_v18 = vmul.f32 %v600_v1, %v496_v7  ;;  %v338_v20 = vmul.f32 %v600_v1, %v497_v9  ;;  %v339_v22 = vmul.f32 %v600_v1, %v500_v12  ;;  %v340_v24 = vmul.f32 %v600_v1, %v501_v14 }
  0x13   : > { %v309_v25 = vadd.f32 %v608_v6, %v297_v17  ;;  %v310_v27 = vadd.f32 %v608_v6, %v298_v19  ;;  %v488_v28 = vunpack.c.l.bf16 %v511_v15  ;;  %v504_v29 = vunpack.c.l.bf16 %v514_v16 }
  0x14   : > { %v311_v30 = vadd.f32 %v608_v6, %v299_v21  ;;  %v312_v31 = vadd.f32 %v608_v6, %v300_v23  ;;  %v489_v32 = vunpack.c.h.bf16 %v511_v15  ;;  %v505_v33 = vunpack.c.h.bf16 %v514_v16 }
  0x15   : > { %v345_v35 = vadd.f32 %v337_v18, %v309_v25  ;;  %v346_v36 = vadd.f32 %v338_v20, %v310_v27  ;;  %v301_v37 = vmul.f32 %v595_v0, %v488_v28  ;;  %v341_v38 = vmul.f32 %v600_v1, %v504_v29 }
  0x16   : > { %v347_v40 = vadd.f32 %v339_v22, %v311_v30  ;;  %v348_v41 = vadd.f32 %v340_v24, %v312_v31  ;;  %v302_v42 = vmul.f32 %v595_v0, %v489_v32  ;;  %v342_v43 = vmul.f32 %v600_v1, %v505_v33 }
  0x17   : > { %v357_v44 = vadd.f32 %v625_v26, %v345_v35  ;;  %v358_v45 = vadd.f32 %v625_v26, %v346_v36  ;;  %v313_v46 = vadd.f32 %v608_v6, %v301_v37  ;;  %v492_v47 = vunpack.c.l.bf16 %v512_v34 }
  0x18   : > { %v359_v48 = vadd.f32 %v625_v26, %v347_v40  ;;  %v360_v49 = vadd.f32 %v625_v26, %v348_v41  ;;  %v314_v50 = vadd.f32 %v608_v6, %v302_v42  ;;  %v508_v51 = vunpack.c.l.bf16 %v515_v39 }
  0x19   : > { %vm365_vm0 = vcmp.ge.f32.partialorder %v357_v44, 0.0  ;;  %v373_v52 = vmul.f32 0.01, %v357_v44  ;;  %vm366_vm1 = vcmp.ge.f32.partialorder %v358_v45, 0.0  ;;  %v374_v53 = vmul.f32 0.01, %v358_v45 }
  0x1a   : > { %vm367_vm2 = vcmp.ge.f32.partialorder %v359_v48, 0.0  ;;  %v375_v54 = vmul.f32 0.01, %v359_v48  ;;  %vm368_vm3 = vcmp.ge.f32.partialorder %v360_v49, 0.0  ;;  %v376_v55 = vmul.f32 0.01, %v360_v49 }
  0x1b   : > { %v381_v56 = vsel %vm365_vm0, %v357_v44, %v373_v52  ;;  %v382_v57 = vsel %vm366_vm1, %v358_v45, %v374_v53  ;;  %v349_v58 = vadd.f32 %v341_v38, %v313_v46  ;;  %v350_v59 = vadd.f32 %v342_v43, %v314_v50 }
  0x1c   : > { %389 = vst [vmem:[%s646_s18] sm:$0xff] %v381_v56  ;;  %v383_v60 = vsel %vm367_vm2, %v359_v48, %v375_v54  ;;  %v384_v61 = vsel %vm368_vm3, %v360_v49, %v376_v55  ;;  %v303_v62 = vmul.f32 %v595_v0, %v492_v47  ;;  %v343_v63 = vmul.f32 %v600_v1, %v508_v51 }
  0x1d   : > { %390 = vst [vmem:[%s646_s18 + $0x8] sm:$0xff] %v382_v57  ;;  %v361_v2 = vadd.f32 %v625_v26, %v349_v58  ;;  %v362_v3 = vadd.f32 %v625_v26, %v350_v59  ;;  %v493_v4 = vunpack.c.h.bf16 %v512_v34  ;;  %v509_v5 = vunpack.c.h.bf16 %v515_v39 }
  0x1e   : > { %391 = vst [vmem:[%s646_s18 + $0x10] sm:$0xff] %v383_v60  ;;  %v315_v7 = vadd.f32 %v608_v6, %v303_v62 }
  0x1f   : > { %392 = vst [vmem:[%s646_s18 + $0x18] sm:$0xff] %v384_v61  ;;  %vm369_vm4 = vcmp.ge.f32.partialorder %v361_v2, 0.0  ;;  %v377_v8 = vmul.f32 0.01, %v361_v2  ;;  %vm370_vm5 = vcmp.ge.f32.partialorder %v362_v3, 0.0  ;;  %v304_v9 = vmul.f32 %v595_v0, %v493_v4 }
  0x20   : > { %v378_v10 = vmul.f32 0.01, %v362_v3  ;;  %v351_v11 = vadd.f32 %v343_v63, %v315_v7  ;;  %v344_v12 = vmul.f32 %v600_v1, %v509_v5 }
  0x21   : > { %v385_v13 = vsel %vm369_vm4, %v361_v2, %v377_v8  ;;  %v316_v14 = vadd.f32 %v608_v6, %v304_v9 }
  0x22   : > { %393 = vst [vmem:[%s646_s18 + $0x20] sm:$0xff] %v385_v13  ;;  %v386_v15 = vsel %vm370_vm5, %v362_v3, %v378_v10  ;;  %v363_v16 = vadd.f32 %v625_v26, %v351_v11 }
  0x23   : > { %394 = vst [vmem:[%s646_s18 + $0x28] sm:$0xff] %v386_v15  ;;  %v352_v17 = vadd.f32 %v344_v12, %v316_v14 }
  0x24   : > { %vm371_vm6 = vcmp.ge.f32.partialorder %v363_v16, 0.0  ;;  %v379_v18 = vmul.f32 0.01, %v363_v16 }
  0x25   : > { %v364_v19 = vadd.f32 %v625_v26, %v352_v17 }
  0x26   : > { %v387_v20 = vsel %vm371_vm6, %v363_v16, %v379_v18 }
  0x27   : > { %395 = vst [vmem:[%s646_s18 + $0x30] sm:$0xff] %v387_v20  ;;  %vm372_vm7 = vcmp.ge.f32.partialorder %v364_v19, 0.0  ;;  %v380_v0 = vmul.f32 0.01, %v364_v19 }
  0x29   : > { %v388_v21 = vsel %vm372_vm7, %v364_v19, %v380_v0 }
  0x2a   : > { %396 = vst [vmem:[%s646_s18 + $0x38] sm:$0xff] %v388_v21 }
  0x2b PF: > { %s16_s21 = sadd.s32 1, %s534_s21  }
  0x2c   : > { %p13_p4 = scmp.ge.s32.totalorder %s16_s21, 4  }
  0x2e   :  { %15 = sbr.rel (!%p13_p4) target bundleno = 1 (0x1), region = 77 }

// kernel: basic_block_forward.4
= control target key start
LH: loop header
LB: loop body
LE: loop exit
PB: predicated region body
PF: predicated region fallthrough
CT: control target
= control target key end

     0   :  { %s1264_s30 = smov 0   ;;  %s1412_s0 = inlined_call_operand.vmem [shape: bf16[128,128], index: 0, kind: input, shape index: {}]   ;;  %s1413_s1 = inlined_call_operand.vmem [shape: f32[1,128], index: 1, kind: input, shape index: {}]   ;;  %s1414_s2 = inlined_call_operand.vmem [shape: f32[1,128], index: 2, kind: input, shape index: {}]   ;;  %s1415_s3 = inlined_call_operand.vmem [shape: bf16[128,128], index: 3, kind: input, shape index: {}]   ;;  %s1416_s4 = inlined_call_operand.vmem [shape: bf16[128,128], index: 4, kind: input, shape index: {}]   ;;  %s1417_s5 = inlined_call_operand.vmem [shape: bf16[128,128], index: 5, kind: input, shape index: {}]   ;;  %s1418_s6 = inlined_call_operand.vmem [shape: bf16[128,128], index: 6, kind: output, shape index: {0}]   ;;  %s1419_s7 = inlined_call_operand.vmem [shape: bf16[128,128], index: 7, kind: output, shape index: {1}]   ;;  %s1420_s8 = inlined_call_operand.vmem [shape: f32[16,128], index: 8, kind: output, shape index: {2}]   ;;  %s1421_s9 = inlined_call_operand.vmem [shape: f32[16,128], index: 9, kind: output, shape index: {3}]  }
   0x1 LB: > { %s1270_s10 = sadd.s32 4294967295, %s1212_s30   ;;  %p1001_p0 = scmp.ge.s32.totalorder %s1212_s30, 1  ;;  %s1212_s30 = sphi %s1264_s30, %s20_s30  }
   0x2   : > { %p306_p1 = scmp.lt.s32.totalorder %s1212_s30, 3 }
   0x4   : > { %p307_p2 = pnand %p1001_p0, %p306_p1 }
   0x5   : > { %s1002_s15 = sshll.u32 (!%p307_p2), %s1270_s10, 3  ;;  %s1044_s18 = sshll.u32 (!%p307_p2), %s1270_s10, 6 }
   0x6   : > { %310 = sbr.rel (%p307_p2) target bundleno = 220 (0xdc), region = 44  ;;  %p361_p3 = scmp.lt.s32.totalorder (!%p307_p2), %s1002_s15, 15 }
   0x7   : > { %p384_p4 = scmp.lt.s32.totalorder (!%p307_p2), %s1270_s10, 1 }
   0xb   : > { %v1102_v0 = vld [vmem:[%s1415_s3 + $0x38] sm:$0xff]  ;;  %v1101_v2 = vld [vmem:[%s1415_s3 + $0x30] sm:$0xff]  ;;  %s1423_s15 = smov (!%p361_p3, %s1002_s15), 15  ;;  %v1100_v4 = vld [vmem:[%s1415_s3 + $0x28] sm:$0xff]  ;;  %s1425_s10 = smov (!%p384_p4, %s1270_s10), 1 }
   0xc   : > { %v1114_v1 = vld [vmem:[%s1417_s5 + $0x38] sm:$0xff]  ;;  %524 = vmatpush.bf16.msra.mxu0 %v1102_v0  ;;  %1180 = vmatpush.bf16.msra.mxu2 %v1102_v0  ;;  %v1113_v3 = vld [vmem:[%s1417_s5 + $0x30] sm:$0xff]  ;;  %s1287_s20 = sshll.u32 %s1423_s15, 2  ;;  %v1112_v5 = vld [vmem:[%s1417_s5 + $0x28] sm:$0xff] }
   0xd   : > { %752 = vmatpush.bf16.msra.mxu1 %v1114_v1  ;;  %1188 = vmatpush.bf16.msra.mxu3 %v1114_v1  ;;  %s1296_s25 = scalar_lea.vmem %s1412_s0, %s1287_s20  ;;  %v1306_v9 = vld [vmem:[%s1413_s1] ss:$0 sm:$0xff]  ;;  %v1098_v17 = vld [vmem:[%s1415_s3 + $0x18] sm:$0xff]  ;;  %v1097_v23 = vld [vmem:[%s1415_s3 + $0x10] sm:$0xff]  ;;  %s1357_s17 = scalar_lea.vmem %s1416_s4, %s1287_s20 }
   0xe   : > { %v1116_v6 = vld [vmem:[%s1296_s25] sm:$0xff]   ;;  %v1172_v7 = vld [vmem:[%s1296_s25 + $0x10] sm:$0xff]   ;;  %v1110_v21 = vld [vmem:[%s1417_s5 + $0x18] sm:$0xff]  ;;  %s1378_s22 = scalar_lea.vmem %s1418_s6, %s1287_s20  ;;  %s1384_s26 = scalar_lea.vmem %s1419_s7, %s1287_s20 }
   0xf   : > { %v1117_v8 = vunpack.c.l.bf16 %v1116_v6  ;;  %v1099_v10 = vld [vmem:[%s1415_s3 + $0x20] sm:$0xff]  ;;  %v1118_v11 = vunpack.c.h.bf16 %v1116_v6  ;;  %v1125_v12 = vunpack.c.l.bf16 %v1172_v7  ;;  %v1126_v13 = vunpack.c.h.bf16 %v1172_v7  ;;  %v1109_v27 = vld [vmem:[%s1417_s5 + $0x10] sm:$0xff]  ;;  %v1096_v28 = vld [vmem:[%s1415_s3 + $0x8] sm:$0xff]  ;;  %s1010_s20 = sshll.u32 %s1425_s10, 3 }
  0x10   : > { %525 = vmatpush.bf16.msra.mxu0 %v1101_v2  ;;  %1181 = vmatpush.bf16.msra.mxu2 %v1101_v2  ;;  %v1111_v14 = vld [vmem:[%s1417_s5 + $0x20] sm:$0xff]  ;;  %v1171_v30 = vld [vmem:[%s1296_s25 + $0x8] sm:$0xff]   ;;  %v1173_v31 = vld [vmem:[%s1296_s25 + $0x18] sm:$0xff]   ;;  %v569_v6 = vlaneseq  ;;  %s387_s29 = scalar_lea.vmem %s1420_s8, %s1010_s20  ;;  %s391_s12 = scalar_lea.vmem %s1421_s9, %s1010_s20 }
  0x11   : > { %753 = vmatpush.bf16.msra.mxu1 %v1113_v3  ;;  %1189 = vmatpush.bf16.msra.mxu3 %v1113_v3  ;;  %v412_v15 = vmul.f32 %v1306_v9, %v1117_v8  ;;  %v1318_v16 = vld [vmem:[%s1414_s2] ss:$0 sm:$0xff]  ;;  %v413_v18 = vmul.f32 %v1306_v9, %v1118_v11  ;;  %v416_v19 = vmul.f32 %v1306_v9, %v1125_v12  ;;  %v1108_v35 = vld [vmem:[%s1417_s5 + $0x8] sm:$0xff]  ;;  %v1121_v37 = vunpack.c.l.bf16 %v1171_v30  ;;  %v1105_v50 = vld [vmem:[%s1357_s17 + $0x10] sm:$0xff] }
  0x12   : > { %v417_v20 = vmul.f32 %v1306_v9, %v1126_v13  ;;  %v1122_v38 = vunpack.c.h.bf16 %v1171_v30  ;;  %v1129_v39 = vunpack.c.l.bf16 %v1173_v31  ;;  %v1095_v40 = vld [vmem:[%s1415_s3] sm:$0xff]  ;;  %v1130_v44 = vunpack.c.h.bf16 %v1173_v31 }
  0x13   : > { %v424_v22 = vadd.f32 %v1318_v16, %v412_v15  ;;  %v425_v24 = vadd.f32 %v1318_v16, %v413_v18  ;;  %v428_v25 = vadd.f32 %v1318_v16, %v416_v19  ;;  %v1107_v45 = vld [vmem:[%s1417_s5] sm:$0xff]  ;;  %v414_v48 = vmul.f32 %v1306_v9, %v1121_v37 }
  0x14   : > { %526 = vmatpush.bf16.msra.mxu0 %v1100_v4  ;;  %1182 = vmatpush.bf16.msra.mxu2 %v1100_v4  ;;  %v429_v26 = vadd.f32 %v1318_v16, %v417_v20  ;;  %v1103_v49 = vld [vmem:[%s1357_s17] sm:$0xff]  ;;  %v415_v51 = vmul.f32 %v1306_v9, %v1122_v38  ;;  %v418_v52 = vmul.f32 %v1306_v9, %v1129_v39  ;;  %v1104_v4 = vld [vmem:[%s1357_s17 + $0x8] sm:$0xff] }
  0x15   : > { %754 = vmatpush.bf16.msra.mxu1 %v1112_v5  ;;  %1190 = vmatpush.bf16.msra.mxu3 %v1112_v5  ;;  %vm432_vm0 = vcmp.ge.f32.partialorder %v424_v22, 0.0  ;;  %v440_v29 = vmul.f32 0.01, %v424_v22  ;;  %v441_v32 = vmul.f32 0.01, %v425_v24  ;;  %vm433_vm1 = vcmp.ge.f32.partialorder %v425_v24, 0.0 }
  0x16   : > { %v444_v33 = vmul.f32 0.01, %v428_v25  ;;  %v445_v34 = vmul.f32 0.01, %v429_v26  ;;  %vm436_vm2 = vcmp.ge.f32.partialorder %v428_v25, 0.0  ;;  %vm437_vm3 = vcmp.ge.f32.partialorder %v429_v26, 0.0 }
  0x17   : > { %v448_v36 = vsel %vm432_vm0, %v424_v22, %v440_v29  ;;  %v449_v41 = vsel %vm433_vm1, %v425_v24, %v441_v32  ;;  %v419_v53 = vmul.f32 %v1306_v9, %v1130_v44  ;;  %v426_v54 = vadd.f32 %v1318_v16, %v414_v48  ;;  %v1106_v5 = vld [vmem:[%s1357_s17 + $0x18] sm:$0xff] }
  0x18   : > { %527 = vmatpush.bf16.msra.mxu0 %v1099_v10  ;;  %1183 = vmatpush.bf16.msra.mxu2 %v1099_v10  ;;  %v452_v42 = vsel %vm436_vm2, %v428_v25, %v444_v33  ;;  %v453_v43 = vsel %vm437_vm3, %v429_v26, %v445_v34  ;;  %v456_v46 = vpack.c.bf16 %v449_v41, %v448_v36  ;;  %v570_v9 = vshrl.u32 %v569_v6, 7 }
  0x19   : > { %755 = vmatpush.bf16.msra.mxu1 %v1111_v14  ;;  %1191 = vmatpush.bf16.msra.mxu3 %v1111_v14  ;;  %v458_v47 = vpack.c.bf16 %v453_v43, %v452_v42  ;;  %v427_v55 = vadd.f32 %v1318_v16, %v415_v51  ;;  %v430_v56 = vadd.f32 %v1318_v16, %v418_v52  ;;  %v442_v58 = vmul.f32 0.01, %v426_v54 }
  0x1a   : > { %v431_v57 = vadd.f32 %v1318_v16, %v419_v53  ;;  %vm434_vm4 = vcmp.ge.f32.partialorder %v426_v54, 0.0  ;;  %v571_v10 = vadd.s32 8, %v570_v9  ;;  %v572_v13 = vadd.s32 16, %v570_v9 }
  0x1b   : > { %v443_v59 = vmul.f32 0.01, %v427_v55  ;;  %v446_v60 = vmul.f32 0.01, %v430_v56  ;;  %vm435_vm5 = vcmp.ge.f32.partialorder %v427_v55, 0.0  ;;  %vm438_vm6 = vcmp.ge.f32.partialorder %v430_v56, 0.0 }
  0x1c   : > { %528 = vmatpush.bf16.msra.mxu0 %v1098_v17  ;;  %1184 = vmatpush.bf16.msra.mxu2 %v1098_v17  ;;  %v447_v61 = vmul.f32 0.01, %v431_v57  ;;  %vm439_vm7 = vcmp.ge.f32.partialorder %v431_v57, 0.0  ;;  %v450_v62 = vsel %vm434_vm4, %v426_v54, %v442_v58  ;;  %v579_v14 = vstv %s1044_s18 }
  0x1d   : > { %756 = vmatpush.bf16.msra.mxu1 %v1110_v21  ;;  %1192 = vmatpush.bf16.msra.mxu3 %v1110_v21  ;;  %v451_v63 = vsel %vm435_vm5, %v427_v55, %v443_v59  ;;  %v454_v0 = vsel %vm438_vm6, %v430_v56, %v446_v60  ;;  %v581_v17 = vadd.s32 %v579_v14, %v571_v10  ;;  %v574_v22 = vadd.s32 32, %v570_v9 }
  0x1e   : > { %v455_v1 = vsel %vm439_vm7, %v431_v57, %v447_v61  ;;  %v457_v2 = vpack.c.bf16 %v451_v63, %v450_v62  ;;  %v580_v20 = vadd.s32 %v579_v14, %v570_v9  ;;  %v582_v21 = vadd.s32 %v579_v14, %v572_v13 }
  0x1f   : > { %v459_v3 = vpack.c.bf16 %v455_v1, %v454_v0  ;;  %vm589_vm8 = vcmp.lt.s32.totalorder %v581_v17, 128  ;;  %v575_v24 = vadd.s32 40, %v570_v9  ;;  %v573_v25 = vadd.s32 24, %v570_v9 }
  0x20   : > { %529 = vmatpush.bf16.msra.mxu0 %v1097_v23  ;;  %1185 = vmatpush.bf16.msra.mxu2 %v1097_v23  ;;  %vm588_vm9 = vcmp.lt.s32.totalorder %v580_v20, 128  ;;  %vm590_vm10 = vcmp.lt.s32.totalorder %v582_v21, 128  ;;  %v576_v31 = vadd.s32 48, %v570_v9  ;;  %v584_v32 = vadd.s32 %v579_v14, %v574_v22 }
  0x21   : > { %757 = vmatpush.bf16.msra.mxu1 %v1109_v27  ;;  %1193 = vmatpush.bf16.msra.mxu3 %v1109_v27  ;;  %v583_v37 = vadd.s32 %v579_v14, %v573_v25  ;;  %v577_v39 = vadd.s32 56, %v570_v9 }
  0x22   : > { %vm592_vm11 = vcmp.lt.s32.totalorder %v584_v32, 128 }
  0x23   : > { %vm591_vm13 = vcmp.lt.s32.totalorder %v583_v37, 128  ;;  %v587_v51 = vadd.s32 %v579_v14, %v577_v39 }
  0x24   : > { %530 = vmatpush.bf16.msra.mxu0 %v1096_v28  ;;  %1186 = vmatpush.bf16.msra.mxu2 %v1096_v28 }
  0x25   : > { %758 = vmatpush.bf16.msra.mxu1 %v1108_v35  ;;  %1194 = vmatpush.bf16.msra.mxu3 %v1108_v35  ;;  %v585_v35 = vadd.s32 %v579_v14, %v575_v24  ;;  %vm595_vm15 = vcmp.lt.s32.totalorder %v587_v51, 128 }
  0x27   : > { %vm593_vm12 = vcmp.lt.s32.totalorder %v585_v35, 128 }
  0x28   : > { %531 = vmatpush.bf16.msra.mxu0 %v1095_v40  ;;  %1187 = vmatpush.bf16.msra.mxu2 %v1095_v40  ;;  %v586_v40 = vadd.s32 %v579_v14, %v576_v31 }
  0x29   : > { %759 = vmatpush.bf16.msra.mxu1 %v1107_v45  ;;  %1195 = vmatpush.bf16.msra.mxu3 %v1107_v45 }
  0x2a   : > { %vm594_vm14 = vcmp.lt.s32.totalorder %v586_v40, 128 }
  0x2b   : > { %532 = vmatmul.bf16.vlgmr.msra.gmra.mxu0 %v456_v46  ;;  %542 = vmatmul.bf16.vlgmr.msra.gmra.mxu2 %v458_v47 }
  0x2c   : > { %760 = vmatmul.bf16.vlgmr.msra.gmra.mxu1 %v1103_v49  ;;  %770 = vmatmul.bf16.vlgmr.msra.gmra.mxu3 %v1105_v50 }
  0x3b   : > { %537 = vmatmul.bf16.gmra.mxu0 %v457_v2  ;;  %547 = vmatmul.bf16.gmra.mxu2 %v459_v3 }
  0x3c   : > { %765 = vmatmul.bf16.gmra.mxu1 %v1104_v4  ;;  %775 = vmatmul.bf16.gmra.mxu3 %v1106_v5 }
  0xa8   : > { %v533_v7 = vpop.f32.mrf.mxu0 }
  0xa9   : > { %v761_v8 = vpop.f32.mrf.mxu1  ;;  %v612_v34 = vsel %vm588_vm9, %v533_v7, 0.0 }
  0xaa   : > { %v634_v41 = vmul.f32 %v612_v34, %v612_v34  ;;  %v811_v47 = vmul.f32 %v761_v8, %v761_v8 }
  0xae   : > { %v543_v11 = vpop.f32.mrf.mxu2 }
  0xaf   : > { %v1372_v12 = vpop.f32.mrf.mxu3  ;;  %v616_v52 = vsel %vm592_vm11, %v543_v11, 0.0 }
  0xb0   : > { %v535_v15 = vpop.f32.mrf.mxu0  ;;  %v638_v4 = vmul.f32 %v616_v52, %v616_v52 }
  0xb1   : > { %v1134_v16 = vpack.c.bf16 %v535_v15, %v533_v7  ;;  %v763_v18 = vpop.f32.mrf.mxu1  ;;  %v613_v28 = vsel %vm589_vm8, %v535_v15, 0.0 }
  0xb2   : > { %v1154_v19 = vpack.c.bf16 %v763_v18, %v761_v8  ;;  %v635_v38 = vmul.f32 %v613_v28, %v613_v28  ;;  %v812_v42 = vmul.f32 %v763_v18, %v763_v18  ;;  %v620_v44 = vadd.f32 %v613_v28, %v612_v34 }
  0xb3   : > { %1135 = vst [vmem:[%s1378_s22] sm:$0xff] %v1134_v16   ;;  %v797_v45 = vadd.f32 %v763_v18, %v761_v8  ;;  %v815_v8 = vmul.f32 %v1372_v12, %v1372_v12 }
  0xb4   : > { %1155 = vst [vmem:[%s1384_s26] sm:$0xff] %v1154_v19   ;;  %v642_v48 = vadd.f32 %v635_v38, %v634_v41  ;;  %v819_v56 = vadd.f32 %v812_v42, %v811_v47 }
  0xb6   : > { %v545_v23 = vpop.f32.mrf.mxu2 }
  0xb7   : > { %v1144_v26 = vpack.c.bf16 %v545_v23, %v543_v11  ;;  %v773_v27 = vpop.f32.mrf.mxu3  ;;  %v617_v1 = vsel %vm593_vm12, %v545_v23, 0.0 }
  0xb8   : > { %v1164_v29 = vpack.c.bf16 %v773_v27, %v1372_v12  ;;  %v538_v30 = vpop.f32.mrf.mxu0  ;;  %v639_v11 = vmul.f32 %v617_v1, %v617_v1  ;;  %v816_v17 = vmul.f32 %v773_v27, %v773_v27 }
  0xb9   : > { %1175 = vst [vmem:[%s1378_s22 + $0x10] sm:$0xff] %v1144_v26   ;;  %v766_v33 = vpop.f32.mrf.mxu1  ;;  %v614_v36 = vsel %vm590_vm10, %v538_v30, 0.0 }
  0xba   : > { %1178 = vst [vmem:[%s1384_s26 + $0x10] sm:$0xff] %v1164_v29   ;;  %v636_v43 = vmul.f32 %v614_v36, %v614_v36  ;;  %v813_v49 = vmul.f32 %v766_v33, %v766_v33  ;;  %v621_v53 = vadd.f32 %v620_v44, %v614_v36  ;;  %v798_v54 = vadd.f32 %v797_v45, %v766_v33 }
  0xbc   : > { %v643_v57 = vadd.f32 %v642_v48, %v636_v43  ;;  %v820_v2 = vadd.f32 %v819_v56, %v813_v49 }
  0xbe   : > { %v548_v46 = vpop.f32.mrf.mxu2 }
  0xbf   : > { %v776_v50 = vpop.f32.mrf.mxu3  ;;  %v618_v9 = vsel %vm594_vm14, %v548_v46, 0.0 }
  0xc0   : > { %v540_v55 = vpop.f32.mrf.mxu0  ;;  %v640_v22 = vmul.f32 %v618_v9, %v618_v9  ;;  %v817_v25 = vmul.f32 %v776_v50, %v776_v50 }
  0xc1   : > { %v1139_v58 = vpack.c.bf16 %v540_v55, %v538_v30  ;;  %v615_v59 = vsel %vm591_vm13, %v540_v55, 0.0  ;;  %v768_v60 = vpop.f32.mrf.mxu1 }
  0xc2   : > { %v622_v61 = vadd.f32 %v621_v53, %v615_v59  ;;  %v637_v62 = vmul.f32 %v615_v59, %v615_v59  ;;  %v1159_v63 = vpack.c.bf16 %v768_v60, %v766_v33  ;;  %v799_v0 = vadd.f32 %v798_v54, %v768_v60 }
  0xc3   : > { %1174 = vst [vmem:[%s1378_s22 + $0x8] sm:$0xff] %v1139_v58   ;;  %v814_v3 = vmul.f32 %v768_v60, %v768_v60 }
  0xc4   : > { %v623_v5 = vadd.f32 %v622_v61, %v616_v52  ;;  %v644_v6 = vadd.f32 %v643_v57, %v637_v62  ;;  %1177 = vst [vmem:[%s1384_s26 + $0x8] sm:$0xff] %v1159_v63   ;;  %v800_v7 = vadd.f32 %v799_v0, %v1372_v12 }
  0xc5   : > { %v821_v10 = vadd.f32 %v820_v2, %v814_v3 }
  0xc6   : > { %v645_v13 = vadd.f32 %v644_v6, %v638_v4  ;;  %v550_v14 = vpop.f32.mrf.mxu2  ;;  %v624_v15 = vadd.f32 %v623_v5, %v617_v1  ;;  %v801_v16 = vadd.f32 %v800_v7, %v773_v27 }
  0xc7   : > { %v822_v18 = vadd.f32 %v821_v10, %v815_v8  ;;  %v1149_v19 = vpack.c.bf16 %v550_v14, %v548_v46  ;;  %v619_v20 = vsel %vm595_vm15, %v550_v14, 0.0  ;;  %v778_v21 = vpop.f32.mrf.mxu3 }
  0xc8   : > { %v625_v23 = vadd.f32 %v624_v15, %v618_v9  ;;  %v646_v12 = vadd.f32 %v645_v13, %v639_v11  ;;  %v1169_v24 = vpack.c.bf16 %v778_v21, %v776_v50  ;;  %v802_v26 = vadd.f32 %v801_v16, %v776_v50 }
  0xc9   : > { %1176 = vst [vmem:[%s1378_s22 + $0x18] sm:$0xff] %v1149_v19   ;;  %v823_v28 = vadd.f32 %v822_v18, %v816_v17  ;;  %v641_v30 = vmul.f32 %v619_v20, %v619_v20  ;;  %v818_v32 = vmul.f32 %v778_v21, %v778_v21 }
  0xca   : > { %v626_v29 = vadd.f32 %v625_v23, %v619_v20  ;;  %v647_v31 = vadd.f32 %v646_v12, %v640_v22  ;;  %1179 = vst [vmem:[%s1384_s26 + $0x18] sm:$0xff] %v1169_v24   ;;  %v803_v27 = vadd.f32 %v802_v26, %v778_v21 }
  0xcb   : > { %v824_v33 = vadd.f32 %v823_v28, %v817_v25 }
  0xcc   : > { %v627_v34 = vrot.slane %v626_v29, 4  ;;  %v648_v35 = vadd.f32 %v647_v31, %v641_v30  ;;  %v804_v36 = vrot.slane %v803_v27, 4 }
  0xcd   : > { %v825_v37 = vadd.f32 %v824_v33, %v818_v32 }
  0xce   : > { %v628_v38 = vadd.f32 %v627_v34, %v626_v29  ;;  %v649_v39 = vrot.slane %v648_v35, 4  ;;  %v805_v40 = vadd.f32 %v804_v36, %v803_v27 }
  0xcf   : > { %v826_v41 = vrot.slane %v825_v37, 4 }
  0xd0   : > { %v629_v42 = vrot.slane %v628_v38, 2  ;;  %v650_v43 = vadd.f32 %v649_v39, %v648_v35  ;;  %v806_v44 = vrot.slane %v805_v40, 2 }
  0xd1   : > { %v827_v45 = vadd.f32 %v826_v41, %v825_v37 }
  0xd2   : > { %v630_v46 = vadd.f32 %v629_v42, %v628_v38  ;;  %v651_v47 = vrot.slane %v650_v43, 2  ;;  %v807_v48 = vadd.f32 %v806_v44, %v805_v40 }
  0xd3   : > { %v828_v49 = vrot.slane %v827_v45, 2 }
  0xd4   : > { %v631_v50 = vrot.slane %v630_v46, 1  ;;  %v652_v51 = vadd.f32 %v651_v47, %v650_v43  ;;  %v808_v52 = vrot.slane %v807_v48, 1 }
  0xd5   : > { %v829_v53 = vadd.f32 %v828_v49, %v827_v45 }
  0xd6   : > { %v632_v54 = vadd.f32 %v631_v50, %v630_v46  ;;  %v653_v55 = vrot.slane %v652_v51, 1  ;;  %v809_v56 = vadd.f32 %v808_v52, %v807_v48 }
  0xd7   : > { %v830_v57 = vrot.slane %v829_v53, 1 }
  0xd8   : > { %633 = vst [vmem:[%s387_s29] sm:$0x1] %v632_v54  ;;  %v654_v58 = vadd.f32 %v653_v55, %v652_v51 }
  0xd9   : > { %810 = vst [vmem:[%s391_s12] sm:$0x1] %v809_v56  ;;  %v831_v59 = vadd.f32 %v830_v57, %v829_v53 }
  0xda   : > { %655 = vst [vmem:[%s387_s29 + $0x1] sm:$0x1] %v654_v58 }
  0xdb   : > { %832 = vst [vmem:[%s391_s12 + $0x1] sm:$0x1] %v831_v59 }
  0xdc PF: > { %s20_s30 = sadd.s32 1, %s1212_s30  }
  0xdd   : > { %p17_p5 = scmp.ge.s32.totalorder %s20_s30, 4  }
  0xdf   :  { %19 = sbr.rel (!%p17_p5) target bundleno = 1 (0x1), region = 113 }

</bundles_post_ra>
